<compile_context>
chip_gen: v5e
topology: v5e:2x2
jax: 0.10.0
libtpu: 0.0.40
codegen_flags: <defaults>
</compile_context>

<pallas_src>
import math

import jax
import jax.numpy as jnp
from jax.experimental import pallas as pl
from jax.experimental.pallas import tpu as pltpu

NUM_REL = 251
NUM_REL_PAD = 256                  # relation axis padded to a clean MXU K dim
EMBED_DIM = 32                     # parameter['embed_dim'] for this instance
LANES = 128                        # TPU lane width
PACK = LANES // EMBED_DIM          # 4 embeddings packed per 128-lane row
K_PACK = PACK * NUM_REL_PAD        # 1024 block-diagonal table rows

DEFAULT_ROW_TILE = 1024            # flat rows per grid step (= 256 packed rows)


def _round_up(x, m):
    return ((x + m - 1) // m) * m


def _cdiv(a, b):
    return -(-a // b)


def _embedding_gather_kernel(ids_ref, col_ref, table_ref, out_ref):
    """Lane-dense one-hot gather: out[r, g*es:(g+1)*es] = table[ids[r, g]].

    ids_ref:   (TNP, PACK)        int32   -- PACK relation ids per output row
    col_ref:   (TNP, NUM_REL_PAD) int32   -- column iota, VMEM-resident input
    table_ref: (K_PACK, LANES)    float32 -- block-diagonal table, resident
    out_ref:   (TNP, LANES)       float32 -- 128-lane dense output tile
    """
    ids = ids_ref[...]
    col = col_ref[...]
    pack = ids.shape[1]
    # One (TNP, 256) compare per packed slot; concatenating along lanes gives
    # the (TNP, 1024) one-hot with exactly one 1 per 256-wide group.  Total
    # compare/cast element count matches the naive (TN, 256) one-hot.
    onehot = jnp.concatenate(
        [(col == ids[:, g:g + 1]).astype(jnp.float32) for g in range(pack)],
        axis=1)
    # Block-diagonal table routes group g's one-hot into lanes g*es:(g+1)*es.
    # HIGHEST precision keeps the f32 one-hot gather bit-exact on the MXU.
    out_ref[...] = jnp.dot(
        onehot, table_ref[...],
        preferred_element_type=jnp.float32,
        precision=jax.lax.Precision.HIGHEST)


def _choose_packed_tile(np_rows, max_tnp, num_cores):
    """Packed-row tile.  Single-TC: one big tile.  v7x (2 TCs): >= 2 steps."""
    tnp_full = _round_up(np_rows, 8)
    if tnp_full <= max_tnp:
        # v7x: ensure the 'parallel' grid axis has >= 2 steps for moderate N
        # so both TensorCores get work; each half still has >= 128 packed
        # rows (512 flat) to amortize the ~0.35us/step pipeline overhead.
        if num_cores >= 2 and np_rows >= 2 * 128:
            return min(max_tnp, _round_up(_cdiv(np_rows, num_cores), 8))
        return tnp_full
    return max_tnp


def _h_embedding_forward_pallas(triples, table_blockdiag, *, row_tile, num_cores):
    B, T, _ = triples.shape
    k_pack, lanes = table_blockdiag.shape
    es = lanes // PACK
    N = B * T

    rel_ids = triples[:, :, 1].reshape(-1).astype(jnp.int32)        # (N,)

    np_rows = _cdiv(N, PACK)                 # packed output rows needed
    max_tnp = max(8, row_tile // PACK)
    tnp = _choose_packed_tile(np_rows, max_tnp, num_cores)
    np_pad = _round_up(np_rows, tnp)
    n_pad = np_pad * PACK

    if n_pad != N:
        # Padded ids are 0 -> they gather table row 0; sliced away below.
        rel_ids = jnp.pad(rel_ids, (0, n_pad - N))
    ids_packed = rel_ids.reshape(np_pad, PACK)

    # Column iota as a VMEM-resident input (constant index_map): built and
    # DMA'd once per core instead of regenerated on the VPU every grid step.
    col = jax.lax.broadcasted_iota(jnp.int32, (tnp, NUM_REL_PAD), 1)

    grid = (np_pad // tnp,)

    cost = pl.CostEstimate(
        flops=2 * np_pad * k_pack * lanes,
        transcendentals=0,
        bytes_accessed=(ids_packed.size * 4 + col.size * 4
                        + table_blockdiag.size * 4 + np_pad * lanes * 4),
    )

    out_packed = pl.pallas_call(
        _embedding_gather_kernel,
        out_shape=jax.ShapeDtypeStruct((np_pad, lanes), jnp.float32),
        grid_spec=pltpu.PrefetchScalarGridSpec(
            num_scalar_prefetch=0,
            grid=grid,
            in_specs=[
                pl.BlockSpec((tnp, PACK), lambda i: (i, 0)),
                # Same block every step -> iota stays VMEM-resident.
                pl.BlockSpec((tnp, NUM_REL_PAD), lambda i: (0, 0)),
                # Same block every step -> table stays VMEM-resident.
                pl.BlockSpec((k_pack, lanes), lambda i: (0, 0)),
            ],
            out_specs=pl.BlockSpec((tnp, lanes), lambda i: (i, 0)),
        ),
        compiler_params=pltpu.CompilerParams(
            dimension_semantics=("parallel",)),
        cost_estimate=cost,
    )(ids_packed, col, table_blockdiag)

    # (np_pad, 128) -> (n_pad, es) is a pure row-major reshape (free in XLA).
    out_flat = out_packed.reshape(n_pad, es)[:N]
    return out_flat.reshape(B, T, 1, 1, es)


def h_embedding_forward(triples, params, *, row_tile=DEFAULT_ROW_TILE,
                        num_cores=1, min_pallas_rows=2048,
                        force_pallas=False):
    """H_Embedding.forward: (B, T, 3) int triples -> (B, T, 1, 1, es) float32.

    `params` = (table, table_blockdiag) from init_norm_vector.
    Pass num_cores=2 on v7x so moderate-N grids shard across both TensorCores.
    """
    table, table_blockdiag = params
    B, T, _ = triples.shape
    es = table.shape[1]
    N = B * T
    if not force_pallas and N < min_pallas_rows:
        # At tiny N the pallas_call is pure launch/pipeline overhead; XLA's
        # fused gather (which can also fuse into the consumer) wins.
        # TODO(synk): fuse H_Embedding's consumer into the Pallas kernel if a
        #             large-N end-to-end Pallas path ever matters.
        rel_ids = triples[:, :, 1].astype(jnp.int32)
        return jnp.take(table, rel_ids, axis=0).reshape(B, T, 1, 1, es)
    return _h_embedding_forward_pallas(
        triples, table_blockdiag, row_tile=row_tile, num_cores=num_cores)


def init_norm_vector(key, num_rel=NUM_REL, es=EMBED_DIM):
    """xavier_uniform_ init; also builds the lane-dense block-diagonal table.

    Copy g of the (padded-to-256) table occupies rows g*256:(g+1)*256 and
    columns g*es:(g+1)*es, so a one-hot hit at column g*256+id selects
    table[id] into lanes g*es:(g+1)*es.  Built ONCE at parameter-prep time
    (~512 KB); never per forward call.
    """
    limit = math.sqrt(6.0 / (num_rel + es))
    w = jax.random.uniform(key, (num_rel, es), minval=-limit, maxval=limit,
                           dtype=jnp.float32)
    blockdiag = jnp.zeros((K_PACK, LANES), jnp.float32)
    for g in range(PACK):
        blockdiag = blockdiag.at[
            g * NUM_REL_PAD: g * NUM_REL_PAD + num_rel,
            g * es:(g + 1) * es].set(w)
    return w, blockdiag


if __name__ == "__main__":
    key = jax.random.PRNGKey(0)
    k_w, k_t = jax.random.split(key)

    params = init_norm_vector(k_w)
    table = params[0]

    fwd = jax.jit(h_embedding_forward,
                  static_argnames=("row_tile", "num_cores",
                                   "min_pallas_rows", "force_pallas"))

    def make_triples(k, B, T):
        heads = jax.random.randint(k, (B, T, 1), 0, 1000, dtype=jnp.int32)
        rels = jax.random.randint(jax.random.fold_in(k, 1), (B, T, 1), 0,
                                  NUM_REL, dtype=jnp.int32)
        tails = jax.random.randint(jax.random.fold_in(k, 2), (B, T, 1), 0,
                                   1000, dtype=jnp.int32)
        return jnp.concatenate([heads, rels, tails], axis=-1)     # (B, T, 3)

    def ref_fwd(triples):
        B, T, _ = triples.shape
        return table[triples[:, :, 1]].reshape(B, T, 1, 1, EMBED_DIM)

    # 1) Module-sized shapes (B=2, T=8), Pallas path forced (single tile).
    tri_a = make_triples(k_t, 2, 8)
    out_a = jax.block_until_ready(fwd(tri_a, params, force_pallas=True))
    assert out_a.shape == (2, 8, 1, 1, EMBED_DIM), out_a.shape
    assert jnp.allclose(out_a, ref_fwd(tri_a), atol=1e-6), "mismatch (test A)"

    # 2) N not a multiple of PACK + small row_tile -> multi-step grid with the
    #    block-diagonal table / column iota VMEM-resident across steps.
    tri_b = make_triples(jax.random.fold_in(k_t, 7), 3, 67)
    out_b = jax.block_until_ready(
        fwd(tri_b, params, row_tile=128, force_pallas=True))
    assert out_b.shape == (3, 67, 1, 1, EMBED_DIM), out_b.shape
    assert jnp.allclose(out_b, ref_fwd(tri_b), atol=1e-6), "mismatch (test B)"

    # 3) Default dispatch policy at tiny N (falls back to the XLA gather).
    out_c = jax.block_until_ready(fwd(tri_a, params))
    assert jnp.allclose(out_c, ref_fwd(tri_a), atol=1e-6), "mismatch (test C)"

    print("KERNEL_OK")
</pallas_src>

<mosaic_0001>
module attributes {stable_mosaic.version = 11 : i64} {
  func.func @_embedding_gather_kernel(%arg0: i32, %arg1: memref<8x4xi32, #tpu.memory_space<vmem>>, %arg2: memref<8x256xi32, #tpu.memory_space<vmem>>, %arg3: memref<1024x128xf32, #tpu.memory_space<vmem>>, %arg4: memref<8x128xf32, #tpu.memory_space<vmem>>) attributes {dimension_semantics = [#tpu.dimension_semantics<parallel>], iteration_bounds = array<i64: 1>, scalar_prefetch = 0 : i64, scratch_operands = 0 : i64, tpu.core_type = #tpu.core_type<tc>, window_params = [{transform_indices = @transform_0, window_bounds = array<i64: 8, 4>}, {pipeline_mode = #tpu.pipeline_mode<synchronous>, transform_indices = @transform_1, window_bounds = array<i64: 8, 256>}, {pipeline_mode = #tpu.pipeline_mode<synchronous>, transform_indices = @transform_2, window_bounds = array<i64: 1024, 128>}, {transform_indices = @transform_3, window_bounds = array<i64: 8, 128>}]} {
    %c0 = arith.constant 0 : index
    %c0_0 = arith.constant 0 : index
    %0 = vector.load %arg1[%c0, %c0_0] : memref<8x4xi32, #tpu.memory_space<vmem>>, vector<8x4xi32>
    %c0_1 = arith.constant 0 : index
    %c0_2 = arith.constant 0 : index
    %1 = vector.load %arg2[%c0_1, %c0_2] : memref<8x256xi32, #tpu.memory_space<vmem>>, vector<8x256xi32>
    %2 = vector.extract_strided_slice %0 {offsets = [0, 0], sizes = [8, 1], strides = [1, 1]} : vector<8x4xi32> to vector<8x1xi32>
    %3 = vector.broadcast %2 : vector<8x1xi32> to vector<8x256xi32>
    %4 = arith.cmpi eq, %1, %3 : vector<8x256xi32>
    %5 = arith.extui %4 : vector<8x256xi1> to vector<8x256xi32>
    %6 = arith.sitofp %5 : vector<8x256xi32> to vector<8x256xf32>
    %7 = vector.extract_strided_slice %0 {offsets = [0, 1], sizes = [8, 1], strides = [1, 1]} : vector<8x4xi32> to vector<8x1xi32>
    %8 = vector.broadcast %7 : vector<8x1xi32> to vector<8x256xi32>
    %9 = arith.cmpi eq, %1, %8 : vector<8x256xi32>
    %10 = arith.extui %9 : vector<8x256xi1> to vector<8x256xi32>
    %11 = arith.sitofp %10 : vector<8x256xi32> to vector<8x256xf32>
    %12 = vector.extract_strided_slice %0 {offsets = [0, 2], sizes = [8, 1], strides = [1, 1]} : vector<8x4xi32> to vector<8x1xi32>
    %13 = vector.broadcast %12 : vector<8x1xi32> to vector<8x256xi32>
    %14 = arith.cmpi eq, %1, %13 : vector<8x256xi32>
    %15 = arith.extui %14 : vector<8x256xi1> to vector<8x256xi32>
    %16 = arith.sitofp %15 : vector<8x256xi32> to vector<8x256xf32>
    %17 = vector.extract_strided_slice %0 {offsets = [0, 3], sizes = [8, 1], strides = [1, 1]} : vector<8x4xi32> to vector<8x1xi32>
    %18 = vector.broadcast %17 : vector<8x1xi32> to vector<8x256xi32>
    %19 = arith.cmpi eq, %1, %18 : vector<8x256xi32>
    %20 = arith.extui %19 : vector<8x256xi1> to vector<8x256xi32>
    %21 = arith.sitofp %20 : vector<8x256xi32> to vector<8x256xf32>
    %22 = tpu.concatenate %6, %11, %16, %21 in 1 : vector<8x256xf32>, vector<8x256xf32>, vector<8x256xf32>, vector<8x256xf32> -> vector<8x1024xf32>
    %c0_3 = arith.constant 0 : index
    %c0_4 = arith.constant 0 : index
    %23 = vector.load %arg3[%c0_3, %c0_4] : memref<1024x128xf32, #tpu.memory_space<vmem>>, vector<1024x128xf32>
    %cst = arith.constant dense<0.000000e+00> : vector<8x128xf32>
    %24 = tpu.matmul %22, %23, %cst {dimension_numbers = #tpu.dot_dimension_numbers<[1], [0], [0], [1], [0, 0, 1, 1], [], []>, precision = #tpu.contract_precision<fp32>} : vector<8x1024xf32>, vector<1024x128xf32>, vector<8x128xf32> -> vector<8x128xf32>
    %c0_5 = arith.constant 0 : index
    %c0_6 = arith.constant 0 : index
    %25 = vector.load %arg4[%c0_5, %c0_6] : memref<8x128xf32, #tpu.memory_space<vmem>>, vector<8x128xf32>
    tpu.vector_store %arg4[%c0_5, %c0_6], %24 {strides = array<i32>} : memref<8x128xf32, #tpu.memory_space<vmem>>, vector<8x128xf32>,
    return
  }
  func.func @transform_0(%arg0: i32) -> (i32, i32) {
    %c0_i32 = arith.constant 0 : i32
    %c0_i32_0 = arith.constant 0 : i32
    return %arg0, %c0_i32 : i32, i32
  }
  func.func @transform_1(%arg0: i32) -> (i32, i32) {
    %c0_i32 = arith.constant 0 : i32
    %c0_i32_0 = arith.constant 0 : i32
    %c0_i32_1 = arith.constant 0 : i32
    return %c0_i32, %c0_i32_0 : i32, i32
  }
  func.func @transform_2(%arg0: i32) -> (i32, i32) {
    %c0_i32 = arith.constant 0 : i32
    %c0_i32_0 = arith.constant 0 : i32
    %c0_i32_1 = arith.constant 0 : i32
    return %c0_i32, %c0_i32_0 : i32, i32
  }
  func.func @transform_3(%arg0: i32) -> (i32, i32) {
    %c0_i32 = arith.constant 0 : i32
    %c0_i32_0 = arith.constant 0 : i32
    return %arg0, %c0_i32 : i32, i32
  }
}

</mosaic_0001>

<bundles_post_ra>
// kernel: squeeze.1
= control target key start
LH: loop header
LB: loop body
LE: loop exit
PB: predicated region body
PF: predicated region fallthrough
CT: control target
= control target key end

     0   :  { %vm7_vm0 = vcmask 64512   ;;  %vm13_vm1 = vcmask 130112   ;;  %s39_s0 = inlined_call_operand.vmem [shape: s32[2,8,1], index: 0, kind: input, shape index: {}]   ;;  %s40_s1 = inlined_call_operand.vmem [shape: s32[16], index: 1, kind: output, shape index: {}]  }
   0x1   :  { %v4_v0 = vld [vmem:[%s39_s0] sm:$0x3]  ;;  %s22_s0 = smov 8  }
   0x2   :  { %5 = vst [vmem:[#allocation1] sm:$0x3] %v4_v0 }
   0x9   :  { %v10_v1 = vld [vmem:[#allocation1 + $0x1] sm:$0x1]   ;;  %v6_v2 = vld [vmem:[#allocation1] sm:$0x1]  }
   0xa   :  { %11 = vrot.lane.b32.xlu0 %v10_v1, %s22_s0  ;;  %8 = vst.msk [vmem:[#allocation0] sm:$0x1] %vm7_vm0, %v6_v2  }
  0x7c   :  { %v12_v3 = vpop.permute.xlu0 %11  }
  0x7d   :  { %14 = vst.msk [vmem:[#allocation0] sm:$0x1] %vm13_vm1, %v12_v3  }
  0x84   :  { %v17_v4 = vld [vmem:[#allocation0] sm:$0x1] }
  0x85   :  { %20 = vst [vmem:[%s40_s1] sm:$0x1] %v17_v4 }

// kernel: h_embedding_forward.1
= control target key start
LH: loop header
LB: loop body
LE: loop exit
PB: predicated region body
PF: predicated region fallthrough
CT: control target
= control target key end

     0   :  { %8 = vsyncpa [#allocation3], 0  ;;  %s3006_s15 = smov [#allocation2]   ;;  %s3007_s17 = smov 128   ;;  %s5197_s0 = inlined_call_operand.vmem [shape: s32[8,4], index: 0, kind: input, shape index: {}]   ;;  %s5198_s1 = inlined_call_operand.vmem [shape: s32[8,256], index: 1, kind: input, shape index: {}]   ;;  %s5199_s2 = inlined_call_operand.hbm [shape: f32[1024,128], index: 2, kind: input, shape index: {}]   ;;  %s5200_s3 = inlined_call_operand.vmem [shape: f32[8,128], index: 3, kind: output, shape index: {}]  }
   0x1   :  { %s17_s14 = sshll.u32 %s5199_s2, 4  ;;  %s19_s16 = sshll.u32 %s3006_s15, 4  ;;  %s18_s14 = int_to_ptr.hbm [resolvable:$true] %s17_s14  ;;  %s20_s16 = int_to_ptr.vmem [resolvable:$true] %s19_s16 }
   0x2   :  { %s3008_s18 = smov 8  }
   0x3   :  { %25 = dma.hbm_to_vmem [thread:$0]  %s18_s14, 16384, %s20_s16, [#allocation3], %s3007_s17, %s3007_s17, %s3008_s18  }
   0x4   :  { %3004 = dma.done.wait [#allocation3], 16384  }
   0x5   :  { %3005 = vsyncadd [#allocation3], 4294950912  ;;  %v3009_v0 = vmov 0   ;;  %v3041_v1 = vld [vmem:[%s5197_s0] sm:$0xff]  ;;  %v84_v2 = vld [vmem:[#allocation2 + $0x78] sm:$0xff]  ;;  %v3010_v40 = vmov 1  }
   0x6   :  { %2972 = vset.pattern.permute.xlu0 %v3009_v0  ;;  %5324 = vst [vmem:[#allocation5_spill] sm:$0xff] %v3041_v1  ;;  %v83_v3 = vld [vmem:[#allocation2 + $0x70] sm:$0xff]  ;;  %v3044_v4 = vand.u32 4294901760, %v84_v2  ;;  %v82_v6 = vld [vmem:[#allocation2 + $0x68] sm:$0xff]  ;;  %v81_v7 = vld [vmem:[#allocation2 + $0x60] sm:$0xff] }
   0x7   :  { %34 = vperm.xlu0 %2972, %v3041_v1   ;;  %v3046_v5 = vand.u32 4294901760, %v83_v3  ;;  %v80_v8 = vld [vmem:[#allocation2 + $0x58] sm:$0xff]  ;;  %v3048_v9 = vand.u32 4294901760, %v82_v6  ;;  %v3050_v10 = vand.u32 4294901760, %v81_v7  ;;  %v79_v12 = vld [vmem:[#allocation2 + $0x50] sm:$0xff]  ;;  %v78_v13 = vld [vmem:[#allocation2 + $0x48] sm:$0xff] }
   0x8   :  { %v3052_v11 = vand.u32 4294901760, %v80_v8  ;;  %v77_v14 = vld [vmem:[#allocation2 + $0x40] sm:$0xff]  ;;  %v3055_v15 = vsub.f32 %v84_v2, %v3044_v4  ;;  %394 = vmatpush.msra.mxu3 %v3044_v4  ;;  %198 = vmatpush.msra.mxu0 %v3044_v4  ;;  %v3062_v17 = vand.u32 4294901760, %v79_v12  ;;  %v3064_v18 = vand.u32 4294901760, %v78_v13  ;;  %v76_v35 = vld [vmem:[#allocation2 + $0x38] sm:$0xff]  ;;  %v75_v36 = vld [vmem:[#allocation2 + $0x30] sm:$0xff] }
   0x9   :  { %v3058_v16 = vsub.f32 %v83_v3, %v3046_v5  ;;  %v3067_v19 = vsub.f32 %v82_v6, %v3048_v9  ;;  %v3070_v20 = vsub.f32 %v81_v7, %v3050_v10  ;;  %v3075_v22 = vand.u32 4294901760, %v77_v14  ;;  %v74_v41 = vld [vmem:[#allocation2 + $0x28] sm:$0xff]  ;;  %v73_v43 = vld [vmem:[#allocation2 + $0x20] sm:$0xff]  ;;  %v72_v48 = vld [vmem:[#allocation2 + $0x18] sm:$0xff] }
   0xa   :  { %v3073_v21 = vsub.f32 %v80_v8, %v3052_v11  ;;  %v5215_v23 = vand.u32 4294901760, %v3055_v15  ;;  %341 = vmatpush.msra.mxu2 %v3055_v15  ;;  %396 = vmatpush.msra.mxu3 %v3046_v5  ;;  %v3082_v25 = vsub.f32 %v79_v12, %v3062_v17  ;;  %v3088_v28 = vsub.f32 %v78_v13, %v3064_v18  ;;  %v71_v56 = vld [vmem:[#allocation2 + $0x10] sm:$0xff]  ;;  %v70_v62 = vld [vmem:[#allocation2 + $0x8] sm:$0xff]  ;;  %v69_v7 = vld [vmem:[#allocation2] sm:$0xff] }
   0xb   :  { %v5214_v24 = vand.u32 4294901760, %v3058_v16  ;;  %v5211_v26 = vand.u32 4294901760, %v3067_v19  ;;  %v5210_v27 = vand.u32 4294901760, %v3070_v20  ;;  %200 = vmatpush.msra.mxu0 %v3046_v5  ;;  %v3105_v34 = vsub.f32 %v77_v14, %v3075_v22  ;;  %v100_v14 = vld [vmem:[#allocation2 + $0xf8] sm:$0xff] }
   0xc   :  { %v241_v29 = vsub.f32 %v3055_v15, %v5215_v23  ;;  %344 = vmatpush.msra.mxu2 %v3058_v16  ;;  %v5209_v31 = vand.u32 4294901760, %v3073_v21  ;;  %398 = vmatpush.msra.mxu3 %v3048_v9  ;;  %v5207_v33 = vand.u32 4294901760, %v3082_v25  ;;  %v5206_v42 = vand.u32 4294901760, %v3088_v28 }
   0xd   :  { %v247_v30 = vsub.f32 %v3058_v16, %v5214_v24  ;;  %v253_v32 = vsub.f32 %v3067_v19, %v5211_v26  ;;  %202 = vmatpush.msra.mxu0 %v3048_v9  ;;  %v259_v39 = vsub.f32 %v3070_v20, %v5210_v27  ;;  %v3118_v46 = vand.u32 4294901760, %v76_v35 }
   0xe   :  { %v242_v37 = vand.u32 4294901760, %v241_v29  ;;  %347 = vmatpush.msra.mxu2 %v3067_v19  ;;  %400 = vmatpush.msra.mxu3 %v3050_v10  ;;  %v265_v45 = vsub.f32 %v3073_v21, %v5209_v31  ;;  %v3120_v47 = vand.u32 4294901760, %v75_v36  ;;  %v271_v49 = vsub.f32 %v3082_v25, %v5207_v33  ;;  %v99_v29 = vld [vmem:[#allocation2 + $0xf0] sm:$0xff] }
   0xf   :  { %v248_v38 = vand.u32 4294901760, %v247_v30  ;;  %2973 = vset.pattern.permute.xlu0 %v3010_v40  ;;  %v254_v44 = vand.u32 4294901760, %v253_v32  ;;  %v5205_v50 = vand.u32 4294901760, %v3105_v34  ;;  %204 = vmatpush.msra.mxu0 %v3050_v10  ;;  %v3128_v51 = vand.u32 4294901760, %v74_v41 }
  0x10   :  { %43 = vperm.xlu0 %2973, %v3041_v1   ;;  %243 = vmatpush.msra.mxu1 %v242_v37  ;;  %v260_v52 = vand.u32 4294901760, %v259_v39  ;;  %v3132_v53 = vsub.f32 %v76_v35, %v3118_v46  ;;  %v3135_v54 = vsub.f32 %v75_v36, %v3120_v47  ;;  %v3137_v55 = vand.u32 4294901760, %v73_v43  ;;  %v98_v35 = vld [vmem:[#allocation2 + $0xe8] sm:$0xff]  ;;  %v97_v39 = vld [vmem:[#allocation2 + $0xe0] sm:$0xff] }
  0x11   :  { %350 = vmatpush.msra.mxu2 %v3070_v20  ;;  %402 = vmatpush.msra.mxu3 %v3052_v11  ;;  %v3142_v57 = vsub.f32 %v74_v41, %v3128_v51  ;;  %v3144_v58 = vand.u32 4294901760, %v72_v48  ;;  %v266_v59 = vand.u32 4294901760, %v265_v45  ;;  %v277_v60 = vsub.f32 %v3088_v28, %v5206_v42  ;;  %v96_v45 = vld [vmem:[#allocation2 + $0xd8] sm:$0xff] }
  0x12   :  { %249 = vmatpush.msra.mxu1 %v248_v38  ;;  %206 = vmatpush.msra.mxu0 %v3052_v11  ;;  %v5203_v61 = vand.u32 4294901760, %v3132_v53  ;;  %v283_v63 = vsub.f32 %v3105_v34, %v5205_v50  ;;  %v3156_v0 = vand.u32 4294901760, %v71_v56  ;;  %v272_v2 = vand.u32 4294901760, %v271_v49 }
  0x13   :  { %353 = vmatpush.msra.mxu2 %v3073_v21  ;;  %404 = vmatpush.msra.mxu3 %v3062_v17  ;;  %v5202_v3 = vand.u32 4294901760, %v3135_v54  ;;  %v3161_v6 = vsub.f32 %v73_v43, %v3137_v55  ;;  %v5201_v8 = vand.u32 4294901760, %v3142_v57  ;;  %v3167_v12 = vsub.f32 %v72_v48, %v3144_v58 }
  0x14   :  { %255 = vmatpush.msra.mxu1 %v254_v44  ;;  %208 = vmatpush.msra.mxu0 %v3062_v17  ;;  %v3169_v13 = vand.u32 4294901760, %v70_v62  ;;  %v278_v30 = vand.u32 4294901760, %v277_v60  ;;  %v289_v32 = vsub.f32 %v3132_v53, %v5203_v61  ;;  %v284_v36 = vand.u32 4294901760, %v283_v63 }
  0x15   :  { %356 = vmatpush.msra.mxu2 %v3082_v25  ;;  %406 = vmatpush.msra.mxu3 %v3064_v18  ;;  %v3178_v37 = vsub.f32 %v71_v56, %v3156_v0  ;;  %v3180_v38 = vand.u32 4294901760, %v69_v7  ;;  %v295_v40 = vsub.f32 %v3135_v54, %v5202_v3  ;;  %v5204_v41 = vand.u32 4294901760, %v3161_v6 }
  0x16   :  { %261 = vmatpush.msra.mxu1 %v260_v52  ;;  %210 = vmatpush.msra.mxu0 %v3064_v18  ;;  %v3187_v43 = vand.u32 4294901760, %v100_v14  ;;  %v3189_v44 = vand.u32 4294901760, %v99_v29  ;;  %v301_v48 = vsub.f32 %v3142_v57, %v5201_v8  ;;  %v5208_v49 = vand.u32 4294901760, %v3167_v12  ;;  %v95_v8 = vld [vmem:[#allocation2 + $0xd0] sm:$0xff] }
  0x17   :  { %359 = vmatpush.msra.mxu2 %v3088_v28  ;;  %408 = vmatpush.msra.mxu3 %v3075_v22  ;;  %v3198_v52 = vsub.f32 %v70_v62, %v3169_v13  ;;  %v3200_v56 = vand.u32 4294901760, %v98_v35  ;;  %v3214_v62 = vsub.f32 %v69_v7, %v3180_v38  ;;  %v5213_v3 = vand.u32 4294901760, %v3178_v37 }
  0x18   :  { %267 = vmatpush.msra.mxu1 %v266_v59  ;;  %212 = vmatpush.msra.mxu0 %v3075_v22  ;;  %v290_v59 = vand.u32 4294901760, %v289_v32  ;;  %v3204_v60 = vsub.f32 %v100_v14, %v3187_v43  ;;  %v3207_v63 = vsub.f32 %v99_v29, %v3189_v44  ;;  %v3219_v32 = vand.u32 4294901760, %v96_v45 }
  0x19   :  { %362 = vmatpush.msra.mxu2 %v3105_v34  ;;  %410 = vmatpush.msra.mxu3 %v3118_v46  ;;  %v296_v14 = vand.u32 4294901760, %v295_v40  ;;  %v307_v29 = vsub.f32 %v3161_v6, %v5204_v41  ;;  %v302_v40 = vand.u32 4294901760, %v301_v48  ;;  %v313_v41 = vsub.f32 %v3167_v12, %v5208_v49  ;;  %v93_v49 = vld [vmem:[#allocation2 + $0xc0] sm:$0xff] }
  0x1a   :  { %273 = vmatpush.msra.mxu1 %v272_v2  ;;  %214 = vmatpush.msra.mxu0 %v3118_v46  ;;  %5325 = vst [vmem:[#allocation6_spill] sm:$0xff] %v3204_v60  ;;  %v3209_v2 = vand.u32 4294901760, %v97_v39  ;;  %v5212_v61 = vand.u32 4294901760, %v3204_v60  ;;  %v5216_v7 = vand.u32 4294901760, %v3207_v63  ;;  %v5217_v50 = vand.u32 4294901760, %v3198_v52 }
  0x1b   :  { %365 = vmatpush.msra.mxu2 %v3132_v53  ;;  %412 = vmatpush.msra.mxu3 %v3120_v47  ;;  %5326 = vst [vmem:[#allocation7_spill] sm:$0xff] %v3207_v63  ;;  %v3247_v33 = vsub.f32 %v96_v45, %v3219_v32  ;;  %v308_v31 = vand.u32 4294901760, %v307_v29  ;;  %v5222_v27 = vand.u32 4294901760, %v3214_v62  ;;  %v92_v29 = vld [vmem:[#allocation2 + $0xb8] sm:$0xff]  ;;  %v3269_v23 = vand.u32 4294901760, %v93_v49 }
  0x1c   :  { %279 = vmatpush.msra.mxu1 %v278_v30  ;;  %216 = vmatpush.msra.mxu0 %v3120_v47  ;;  %v3217_v30 = vsub.f32 %v98_v35, %v3200_v56  ;;  %v3230_v35 = vand.u32 4294901760, %v95_v8  ;;  %v3238_v42 = vsub.f32 %v97_v39, %v3209_v2  ;;  %v319_v39 = vsub.f32 %v3178_v37, %v5213_v3 }
  0x1d   :  { %368 = vmatpush.msra.mxu2 %v3135_v54  ;;  %414 = vmatpush.msra.mxu3 %v3128_v51  ;;  %5329 = vst [vmem:[#allocation10_spill] sm:$0xff] %v3247_v33  ;;  %v588_v45 = vsub.f32 %v3207_v63, %v5216_v7  ;;  %v325_v3 = vsub.f32 %v3198_v52, %v5217_v50  ;;  %v3284_v63 = vand.u32 4294901760, %v92_v29 }
  0x1e   :  { %5327 = vst [vmem:[#allocation8_spill] sm:$0xff] %v3217_v30  ;;  %285 = vmatpush.msra.mxu1 %v284_v36  ;;  %218 = vmatpush.msra.mxu0 %v3128_v51  ;;  %v94_v36 = vld [vmem:[#allocation2 + $0xc8] sm:$0xff]  ;;  %v5221_v48 = vand.u32 4294901760, %v3217_v30  ;;  %v320_v50 = vand.u32 4294901760, %v319_v39  ;;  %v331_v24 = vsub.f32 %v3214_v62, %v5222_v27  ;;  %v5330_v27 = vand.u32 4294901760, %v3238_v42 }
  0x1f   :  { %371 = vmatpush.msra.mxu2 %v3142_v57  ;;  %416 = vmatpush.msra.mxu3 %v3137_v55  ;;  %5328 = vst [vmem:[#allocation9_spill] sm:$0xff] %v3238_v42  ;;  %v3254_v26 = vand.u32 4294901760, %v94_v36  ;;  %v326_v39 = vand.u32 4294901760, %v325_v3  ;;  %v89_v3 = vld [vmem:[#allocation2 + $0xa0] sm:$0xff] }
  0x20   :  { %291 = vmatpush.msra.mxu1 %v290_v59  ;;  %220 = vmatpush.msra.mxu0 %v3137_v55  ;;  %v582_v59 = vsub.f32 %v3204_v60, %v5212_v61  ;;  %v314_v61 = vand.u32 4294901760, %v313_v41  ;;  %v600_v41 = vsub.f32 %v3238_v42, %v5330_v27  ;;  %v332_v60 = vand.u32 4294901760, %v331_v24 }
  0x21   :  { %374 = vmatpush.msra.mxu2 %v3161_v6  ;;  %418 = vmatpush.msra.mxu3 %v3144_v58  ;;  %v3282_v1 = vsub.f32 %v94_v36, %v3254_v26  ;;  %v3294_v36 = vsub.f32 %v93_v49, %v3269_v23  ;;  %v3305_v49 = vsub.f32 %v92_v29, %v3284_v63  ;;  %v5333_v24 = vand.u32 4294901760, %v3055_v15 }
  0x22   :  { %297 = vmatpush.msra.mxu1 %v296_v14  ;;  %222 = vmatpush.msra.mxu0 %v3144_v58  ;;  %v3262_v14 = vsub.f32 %v95_v8, %v3230_v35  ;;  %v583_v7 = vand.u32 4294901760, %v582_v59  ;;  %v594_v8 = vsub.f32 %v3217_v30, %v5221_v48  ;;  %v589_v59 = vand.u32 4294901760, %v588_v45 }
  0x23   :  { %377 = vmatpush.msra.mxu2 %v3167_v12  ;;  %420 = vmatpush.msra.mxu3 %v3156_v0  ;;  %v5331_v48 = vand.u32 4294901760, %v3247_v33  ;;  %v623_v27 = vand.u32 4294901760, %v3294_v36 }
  0x24   :  { %303 = vmatpush.msra.mxu1 %v302_v40  ;;  %224 = vmatpush.msra.mxu0 %v3156_v0  ;;  %v91_v40 = vld [vmem:[#allocation2 + $0xb0] sm:$0xff]  ;;  %v595_v45 = vand.u32 4294901760, %v594_v8 }
  0x25   :  { %380 = vmatpush.msra.mxu2 %v3178_v37  ;;  %422 = vmatpush.msra.mxu3 %v3169_v13  ;;  %v3296_v30 = vand.u32 4294901760, %v91_v40 }
  0x26   :  { %309 = vmatpush.msra.mxu1 %v308_v31  ;;  %226 = vmatpush.msra.mxu0 %v3169_v13  ;;  %v90_v31 = vld [vmem:[#allocation2 + $0xa8] sm:$0xff] }
  0x27   :  { %383 = vmatpush.msra.mxu2 %v3198_v52  ;;  %424 = vmatpush.msra.mxu3 %v3180_v38  ;;  %v3307_v42 = vand.u32 4294901760, %v90_v31  ;;  %v3317_v29 = vsub.f32 %v91_v40, %v3296_v30 }
  0x28   :  { %315 = vmatpush.msra.mxu1 %v314_v61  ;;  %v606_v61 = vsub.f32 %v3247_v33, %v5331_v48  ;;  %228 = vmatpush.msra.mxu0 %v3180_v38  ;;  %v88_v48 = vld [vmem:[#allocation2 + $0x98] sm:$0xff]  ;;  %v3319_v33 = vand.u32 4294901760, %v89_v3 }
  0x29   :  { %386 = vmatpush.msra.mxu2 %v3214_v62  ;;  %584 = vmatpush.msrb.mxu3 %v583_v7  ;;  %v5332_v7 = vand.u32 4294901760, %v3262_v14  ;;  %v3331_v40 = vand.u32 4294901760, %v88_v48 }
  0x2a   :  { %321 = vmatpush.msra.mxu1 %v320_v50  ;;  %435 = vmatpush.msrb.mxu0 %v5333_v24  ;;  %v601_v50 = vand.u32 4294901760, %v600_v41  ;;  %v629_v41 = vand.u32 4294901760, %v3305_v49  ;;  %v3329_v24 = vsub.f32 %v90_v31, %v3307_v42  ;;  %v3342_v31 = vsub.f32 %v89_v3, %v3319_v33 }
  0x2b   :  { %539 = vmatpush.msrb.mxu2 %v3187_v43  ;;  %590 = vmatpush.msrb.mxu3 %v589_v59  ;;  %v612_v8 = vsub.f32 %v3262_v14, %v5332_v7  ;;  %v607_v59 = vand.u32 4294901760, %v606_v61  ;;  %v5334_v7 = vand.u32 4294901760, %v3058_v16  ;;  %v635_v61 = vand.u32 4294901760, %v3317_v29 }
  0x2c   :  { %327 = vmatpush.msra.mxu1 %v326_v39  ;;  %v5335_v39 = vand.u32 4294901760, %v3282_v1 }
  0x2d   :  { %541 = vmatpush.msrb.mxu2 %v3189_v44  ;;  %596 = vmatpush.msrb.mxu3 %v595_v45  ;;  %v613_v16 = vand.u32 4294901760, %v612_v8  ;;  %v624_v45 = vsub.f32 %v3294_v36, %v623_v27  ;;  %v630_v8 = vsub.f32 %v3305_v49, %v629_v41  ;;  %v636_v3 = vsub.f32 %v3317_v29, %v635_v61 }
  0x2e   :  { %333 = vmatpush.msra.mxu1 %v332_v60  ;;  %439 = vmatpush.msrb.mxu0 %v5334_v7  ;;  %v618_v15 = vsub.f32 %v3282_v1, %v5335_v39  ;;  %v5336_v60 = vand.u32 4294901760, %v3067_v19  ;;  %v3353_v7 = vsub.f32 %v88_v48, %v3331_v40 }
  0x2f   :  { %543 = vmatpush.msrb.mxu2 %v3200_v56  ;;  %602 = vmatpush.msrb.mxu3 %v601_v50  ;;  %v641_v50 = vand.u32 4294901760, %v3329_v24  ;;  %v631_v48 = vand.u32 4294901760, %v630_v8 }
  0x30   :  { %502 = vmatpush.msrb.mxu1 %v3044_v4  ;;  %443 = vmatpush.msrb.mxu0 %v5336_v60  ;;  %v5337_v4 = vand.u32 4294901760, %v3070_v20  ;;  %v619_v19 = vand.u32 4294901760, %v618_v15  ;;  %v625_v20 = vand.u32 4294901760, %v624_v45  ;;  %v653_v39 = vand.u32 4294901760, %v3353_v7  ;;  %v87_v45 = vld [vmem:[#allocation2 + $0x90] sm:$0xff] }
  0x31   :  { %545 = vmatpush.msrb.mxu2 %v3209_v2  ;;  %608 = vmatpush.msrb.mxu3 %v607_v59  ;;  %v647_v59 = vand.u32 4294901760, %v3342_v31  ;;  %v637_v15 = vand.u32 4294901760, %v636_v3  ;;  %v5341_v60 = vand.u32 4294901760, %v3105_v34  ;;  %v5343_v34 = vand.u32 4294901760, %v3135_v54 }
  0x32   :  { %504 = vmatpush.msrb.mxu1 %v3046_v5  ;;  %447 = vmatpush.msrb.mxu0 %v5337_v4  ;;  %v5338_v5 = vand.u32 4294901760, %v3073_v21  ;;  %v642_v21 = vsub.f32 %v3329_v24, %v641_v50  ;;  %v5347_v54 = vand.u32 4294901760, %v3178_v37 }
  0x33   :  { %547 = vmatpush.msrb.mxu2 %v3219_v32  ;;  %614 = vmatpush.msrb.mxu3 %v613_v16  ;;  %v654_v16 = vsub.f32 %v3353_v7, %v653_v39 }
  0x34   :  { %506 = vmatpush.msrb.mxu1 %v3048_v9  ;;  %451 = vmatpush.msrb.mxu0 %v5338_v5  ;;  %v5339_v9 = vand.u32 4294901760, %v3082_v25  ;;  %v648_v25 = vsub.f32 %v3342_v31, %v647_v59 }
  0x35   :  { %549 = vmatpush.msrb.mxu2 %v3230_v35  ;;  %620 = vmatpush.msrb.mxu3 %v619_v19  ;;  %v655_v4 = vand.u32 4294901760, %v654_v16 }
  0x36   :  { %508 = vmatpush.msrb.mxu1 %v3050_v10  ;;  %455 = vmatpush.msrb.mxu0 %v5339_v9  ;;  %v5340_v10 = vand.u32 4294901760, %v3088_v28  ;;  %v5342_v28 = vand.u32 4294901760, %v3132_v53  ;;  %v5345_v53 = vand.u32 4294901760, %v3161_v6  ;;  %v3448_v9 = vld [vmem:[%s5198_s1] sm:$0xff] }
  0x37   :  { %551 = vmatpush.msrb.mxu2 %v3254_v26  ;;  %626 = vmatpush.msrb.mxu3 %v625_v20 }
  0x38   :  { %510 = vmatpush.msrb.mxu1 %v3052_v11  ;;  %459 = vmatpush.msrb.mxu0 %v5340_v10  ;;  %v643_v11 = vand.u32 4294901760, %v642_v21  ;;  %v5241_v10 = vmov 0.0  }
  0x39   :  { %553 = vmatpush.msrb.mxu2 %v3269_v23  ;;  %632 = vmatpush.msrb.mxu3 %v631_v48  ;;  %v3453_v48 = vld [vmem:[%s5198_s1 + $0x8] sm:$0xff] }
  0x3a   :  { %512 = vmatpush.msrb.mxu1 %v3062_v17  ;;  %463 = vmatpush.msrb.mxu0 %v5341_v60  ;;  %v649_v17 = vand.u32 4294901760, %v648_v25  ;;  %v5249_v25 = vmov 1.0  }
  0x3b   :  { %555 = vmatpush.msrb.mxu2 %v3284_v63  ;;  %638 = vmatpush.msrb.mxu3 %v637_v15 }
  0x3c   :  { %514 = vmatpush.msrb.mxu1 %v3064_v18  ;;  %467 = vmatpush.msrb.mxu0 %v5342_v28  ;;  %v5344_v18 = vand.u32 4294901760, %v3142_v57  ;;  %v5349_v57 = vand.u32 4294901760, %v3214_v62 }
  0x3d   :  { %557 = vmatpush.msrb.mxu2 %v3296_v30  ;;  %644 = vmatpush.msrb.mxu3 %v643_v11 }
  0x3e   :  { %516 = vmatpush.msrb.mxu1 %v3075_v22  ;;  %471 = vmatpush.msrb.mxu0 %v5343_v34  ;;  %v3399_v22 = vand.u32 4294901760, %v87_v45  ;;  %v5350_v34 = vld [vmem:[#allocation6_spill] sm:$0xff] }
  0x3f   :  { %559 = vmatpush.msrb.mxu2 %v3307_v42  ;;  %650 = vmatpush.msrb.mxu3 %v649_v17 }
  0x40   :  { %518 = vmatpush.msrb.mxu1 %v3118_v46  ;;  %475 = vmatpush.msrb.mxu0 %v5344_v18  ;;  %v5346_v46 = vand.u32 4294901760, %v3167_v12  ;;  %v85_v12 = vld [vmem:[#allocation2 + $0x80] sm:$0xff]  ;;  %v5352_v18 = vld [vmem:[#allocation7_spill] sm:$0xff] }
  0x41   :  { %561 = vmatpush.msrb.mxu2 %v3319_v33  ;;  %656 = vmatpush.msrb.mxu3 %v655_v4  ;;  %v3425_v37 = vand.u32 4294901760, %v85_v12 }
  0x42   :  { %520 = vmatpush.msrb.mxu1 %v3120_v47  ;;  %479 = vmatpush.msrb.mxu0 %v5345_v53  ;;  %v5348_v47 = vand.u32 4294901760, %v3198_v52  ;;  %v5353_v53 = vand.u32 4294901760, %v5352_v18 }
  0x43   :  { %563 = vmatpush.msrb.mxu2 %v3331_v40  ;;  %v3436_v52 = vsub.f32 %v85_v12, %v3425_v37 }
  0x44   :  { %522 = vmatpush.msrb.mxu1 %v3128_v51  ;;  %483 = vmatpush.msrb.mxu0 %v5346_v46  ;;  %v86_v51 = vld [vmem:[#allocation2 + $0x88] sm:$0xff] }
  0x45   :  { %565 = vmatpush.msrb.mxu2 %v3399_v22  ;;  %v3418_v6 = vand.u32 4294901760, %v86_v51  ;;  %v671_v8 = vand.u32 4294901760, %v3436_v52 }
  0x46   :  { %524 = vmatpush.msrb.mxu1 %v3137_v55  ;;  %487 = vmatpush.msrb.mxu0 %v5347_v54  ;;  %v3421_v55 = vsub.f32 %v87_v45, %v3399_v22  ;;  %v5351_v45 = vand.u32 4294901760, %v5350_v34 }
  0x47   :  { %567 = vmatpush.msrb.mxu2 %v3418_v6  ;;  %v672_v20 = vsub.f32 %v3436_v52, %v671_v8 }
  0x48   :  { %526 = vmatpush.msrb.mxu1 %v3144_v58  ;;  %491 = vmatpush.msrb.mxu0 %v5348_v47  ;;  %v659_v58 = vand.u32 4294901760, %v3421_v55  ;;  %v5354_v47 = vld [vmem:[#allocation8_spill] sm:$0xff] }
  0x49   :  { %569 = vmatpush.msrb.mxu2 %v3425_v37  ;;  %v673_v3 = vand.u32 4294901760, %v672_v20  ;;  %v5361_v20 = vand.u32 4294901760, %v3282_v1 }
  0x4a   :  { %528 = vmatpush.msrb.mxu1 %v3156_v0  ;;  %495 = vmatpush.msrb.mxu0 %v5349_v57  ;;  %v3428_v0 = vsub.f32 %v86_v51, %v3418_v6  ;;  %v5355_v57 = vand.u32 4294901760, %v5354_v47  ;;  %v5356_v51 = vld [vmem:[#allocation9_spill] sm:$0xff] }
  0x4b   :  { %v5357_v12 = vand.u32 4294901760, %v5356_v51 }
  0x4c   :  { %530 = vmatpush.msrb.mxu1 %v3169_v13  ;;  %v660_v13 = vsub.f32 %v3421_v55, %v659_v58 }
  0x4e   :  { %532 = vmatpush.msrb.mxu1 %v3180_v38  ;;  %v665_v38 = vand.u32 4294901760, %v3428_v0  ;;  %v661_v62 = vand.u32 4294901760, %v660_v13 }
  0x50   :  { %v666_v19 = vsub.f32 %v3428_v0, %v665_v38  ;;  %662 = vmatpush.msrb.mxu3 %v661_v62  ;;  %v116_v62 = vld [vmem:[#allocation2 + $0x178] sm:$0xff] }
  0x52   :  { %v667_v5 = vand.u32 4294901760, %v666_v19  ;;  %v5360_v19 = vand.u32 4294901760, %v3262_v14 }
  0x54   :  { %668 = vmatpush.msrb.mxu3 %v667_v5  ;;  %v3514_v5 = vand.u32 4294901760, %v116_v62 }
  0x56   :  { %674 = vmatpush.msrb.mxu3 %v673_v3 }
  0x79   :  { %v3455_v21 = vpop.permute.xlu0 %34 }
  0x7a   :  { %vm36_vm0 = vcmp.eq.s32.totalorder %v3448_v9, %v3455_v21  ;;  %vm37_vm1 = vcmp.eq.s32.totalorder %v3453_v48, %v3455_v21  ;;  %v3013_v21 = vmov 2  }
  0x7b   :  { %v2932_v15 = vsel %vm37_vm1, 1.0, %v5241_v10  ;;  %2939 = vmatmul.msk.f32.vlgmr.msra.gmra.mxu1 %vm36_vm0, %v5249_v25  ;;  %v2931_v60 = vsel %vm36_vm0, 1.0, %v5241_v10  ;;  %2974 = vset.pattern.permute.xlu1 %v3013_v21  ;;  %v132_v21 = vld [vmem:[#allocation2 + $0x1f8] sm:$0xff] }
  0x7c   :  { %v3473_v11 = vsub.f32 %v2932_v15, %v2932_v15  ;;  %735 = vmatpush.msra.mxu1 %v3187_v43  ;;  %v230_v16 = vsub.f32 %v2931_v60, %v2931_v60 }
  0x7e   :  { %737 = vmatpush.msra.mxu1 %v3189_v44  ;;  %389 = vmatmul.f32.vlgmr.msra.gmra.mxu2 %v230_v16  ;;  %v231_v28 = vand.u32 4294901760, %v230_v16  ;;  %v572_v17 = vand.u32 4294901760, %v3473_v11 }
  0x7f   :  { %776 = vmatpush.msra.mxu2 %v5351_v45 }
  0x80   :  { %739 = vmatpush.msra.mxu1 %v3200_v56  ;;  %428 = vmatmul.f32.vlgmr.msra.gmra.mxu3 %v231_v28  ;;  %v232_v4 = vsub.f32 %v230_v16, %v231_v28  ;;  %v573_v46 = vsub.f32 %v3473_v11, %v572_v17  ;;  %v112_v16 = vld [vmem:[#allocation2 + $0x158] sm:$0xff] }
  0x81   :  { %780 = vmatpush.msra.mxu2 %v5353_v53  ;;  %843 = vmatpush.msra.mxu3 %v3187_v43  ;;  %v107_v53 = vld [vmem:[#allocation2 + $0x130] sm:$0xff] }
  0x82   :  { %741 = vmatpush.msra.mxu1 %v3209_v2  ;;  %v233_v54 = vand.u32 4294901760, %v232_v4  ;;  %v574_v43 = vand.u32 4294901760, %v573_v46  ;;  %v108_v4 = vld [vmem:[#allocation2 + $0x138] sm:$0xff] }
  0x83   :  { %784 = vmatpush.msra.mxu2 %v5355_v57  ;;  %845 = vmatpush.msra.mxu3 %v3189_v44  ;;  %v5358_v44 = vld [vmem:[#allocation10_spill] sm:$0xff]  ;;  %v3613_v46 = vand.u32 4294901760, %v108_v4  ;;  %v3626_v57 = vand.u32 4294901760, %v107_v53 }
  0x84   :  { %2941 = vmatmul.msk.f32.vlgmr.msrb.gmra.mxu1 %vm36_vm0, %v5249_v25  ;;  %234 = vmatmul.f32.vlgmr.msra.gmra.mxu0 %v233_v54  ;;  %v5359_v13 = vand.u32 4294901760, %v5358_v44 }
  0x85   :  { %743 = vmatpush.msra.mxu1 %v3219_v32  ;;  %682 = vmatpush.msra.mxu0 %v5350_v34  ;;  %v109_v34 = vld [vmem:[#allocation2 + $0x140] sm:$0xff] }
  0x86   :  { %788 = vmatpush.msra.mxu2 %v5357_v12  ;;  %847 = vmatpush.msra.mxu3 %v3200_v56  ;;  %v115_v56 = vld [vmem:[#allocation2 + $0x170] sm:$0xff]  ;;  %v3593_v45 = vand.u32 4294901760, %v109_v34  ;;  %v104_v12 = vld [vmem:[#allocation2 + $0x118] sm:$0xff] }
  0x87   :  { %745 = vmatpush.msra.mxu1 %v3230_v35  ;;  %575 = vmatmul.f32.vlgmr.msrb.gmra.mxu2 %v574_v43  ;;  %v3521_v3 = vand.u32 4294901760, %v115_v56  ;;  %v3640_v43 = vsub.f32 %v108_v4, %v3613_v46  ;;  %v101_v4 = vld [vmem:[#allocation2 + $0x100] sm:$0xff] }
  0x88   :  { %685 = vmatpush.msra.mxu0 %v5352_v18  ;;  %792 = vmatpush.msra.mxu2 %v5359_v13  ;;  %v3622_v54 = vsub.f32 %v109_v34, %v3593_v45  ;;  %v3652_v13 = vsub.f32 %v107_v53, %v3626_v57  ;;  %v5362_v34 = vld [vmem:[#allocation5_spill] sm:$0xff] }
  0x89   :  { %849 = vmatpush.msra.mxu3 %v3209_v2  ;;  %747 = vmatpush.msra.mxu1 %v3254_v26  ;;  %v114_v2 = vld [vmem:[#allocation2 + $0x168] sm:$0xff]  ;;  %v3542_v60 = vsub.f32 %v115_v56, %v3521_v3 }
  0x8a   :  { %2942 = vmatmul.msk.f32.vlgmr.msrb.gmra.mxu3 %vm37_vm1, %v5249_v25  ;;  %688 = vmatpush.msra.mxu0 %v5354_v47  ;;  %v3534_v15 = vand.u32 4294901760, %v114_v2 }
  0x8b   :  { %796 = vmatpush.msra.mxu2 %v5360_v19  ;;  %851 = vmatpush.msra.mxu3 %v3219_v32  ;;  %v3532_v32 = vsub.f32 %v116_v62, %v3514_v5  ;;  %v5238_v19 = vand.u32 4294901760, %v3640_v43 }
  0x8c   :  { %749 = vmatpush.msra.mxu1 %v3269_v23  ;;  %691 = vmatpush.msra.mxu0 %v5356_v51 }
  0x8d   :  { %800 = vmatpush.msra.mxu2 %v5361_v20  ;;  %853 = vmatpush.msra.mxu3 %v3230_v35  ;;  %v113_v35 = vld [vmem:[#allocation2 + $0x160] sm:$0xff]  ;;  %v3670_v20 = vand.u32 4294901760, %v104_v12 }
  0x8e   :  { %751 = vmatpush.msra.mxu1 %v3284_v63  ;;  %2940 = vmatmul.msk.f32.vlgmr.msrb.gmra.mxu0 %vm36_vm0, %v5249_v25 }
  0x8f   :  { %694 = vmatpush.msra.mxu0 %v5358_v44  ;;  %804 = vmatpush.msra.mxu2 %v623_v27  ;;  %v3546_v27 = vand.u32 4294901760, %v113_v35  ;;  %v3691_v53 = vsub.f32 %v104_v12, %v3670_v20 }
  0x90   :  { %855 = vmatpush.msra.mxu3 %v3254_v26  ;;  %753 = vmatpush.msra.mxu1 %v3296_v30  ;;  %v5252_v26 = vand.u32 4294901760, %v3532_v32 }
  0x91   :  { %697 = vmatpush.msra.mxu0 %v3262_v14  ;;  %808 = vmatpush.msra.mxu2 %v629_v41  ;;  %v3553_v14 = vsub.f32 %v114_v2, %v3534_v15  ;;  %v3561_v41 = vand.u32 4294901760, %v112_v16  ;;  %v3566_v28 = vsub.f32 %v113_v35, %v3546_v27 }
  0x92   :  { %857 = vmatpush.msra.mxu3 %v3269_v23  ;;  %755 = vmatpush.msra.mxu1 %v3307_v42  ;;  %v111_v23 = vld [vmem:[#allocation2 + $0x150] sm:$0xff] }
  0x93   :  { %700 = vmatpush.msra.mxu0 %v3282_v1  ;;  %812 = vmatpush.msra.mxu2 %v635_v61  ;;  %v5251_v1 = vand.u32 4294901760, %v3542_v60  ;;  %v110_v61 = vld [vmem:[#allocation2 + $0x148] sm:$0xff] }
  0x94   :  { %859 = vmatpush.msra.mxu3 %v3284_v63  ;;  %757 = vmatpush.msra.mxu1 %v3319_v33  ;;  %v923_v63 = vsub.f32 %v3532_v32, %v5252_v26 }
  0x95   :  { %703 = vmatpush.msra.mxu0 %v3294_v36  ;;  %816 = vmatpush.msra.mxu2 %v641_v50  ;;  %v5248_v36 = vand.u32 4294901760, %v3553_v14  ;;  %v3575_v50 = vand.u32 4294901760, %v111_v23 }
  0x96   :  { %861 = vmatpush.msra.mxu3 %v3296_v30  ;;  %759 = vmatpush.msra.mxu1 %v3331_v40  ;;  %v3579_v30 = vand.u32 4294901760, %v110_v61 }
  0x97   :  { %706 = vmatpush.msra.mxu0 %v3305_v49  ;;  %820 = vmatpush.msra.mxu2 %v647_v59  ;;  %v929_v49 = vsub.f32 %v3542_v60, %v5251_v1  ;;  %v3588_v59 = vsub.f32 %v112_v16, %v3561_v41  ;;  %v3602_v18 = vsub.f32 %v111_v23, %v3575_v50  ;;  %v102_v16 = vld [vmem:[#allocation2 + $0x108] sm:$0xff]  ;;  %v5237_v23 = vand.u32 4294901760, %v3652_v13  ;;  %v123_v1 = vld [vmem:[#allocation2 + $0x1b0] sm:$0xff] }
  0x98   :  { %863 = vmatpush.msra.mxu3 %v3307_v42  ;;  %761 = vmatpush.msra.mxu1 %v3399_v22  ;;  %v5246_v42 = vand.u32 4294901760, %v3566_v28 }
  0x99   :  { %709 = vmatpush.msra.mxu0 %v3317_v29  ;;  %824 = vmatpush.msra.mxu2 %v653_v39  ;;  %v924_v29 = vand.u32 4294901760, %v923_v63  ;;  %v935_v39 = vsub.f32 %v3553_v14, %v5248_v36  ;;  %v5243_v47 = vand.u32 4294901760, %v3602_v18 }
  0x9a   :  { %865 = vmatpush.msra.mxu3 %v3319_v33  ;;  %763 = vmatpush.msra.mxu1 %v3418_v6  ;;  %v3607_v33 = vsub.f32 %v110_v61, %v3579_v30 }
  0x9b   :  { %712 = vmatpush.msra.mxu0 %v3329_v24  ;;  %828 = vmatpush.msra.mxu2 %v659_v58  ;;  %v930_v24 = vand.u32 4294901760, %v929_v49  ;;  %v5245_v58 = vand.u32 4294901760, %v3588_v59  ;;  %v953_v44 = vsub.f32 %v3602_v18, %v5243_v47 }
  0x9c   :  { %867 = vmatpush.msra.mxu3 %v3331_v40  ;;  %765 = vmatpush.msra.mxu1 %v3425_v37  ;;  %v941_v40 = vsub.f32 %v3566_v28, %v5246_v42 }
  0x9d   :  { %715 = vmatpush.msra.mxu0 %v3342_v31  ;;  %769 = vmatmul.f32.vlgmr.msra.gmra.mxu1 %v572_v17  ;;  %v106_v31 = vld [vmem:[#allocation2 + $0x128] sm:$0xff]  ;;  %v936_v17 = vand.u32 4294901760, %v935_v39 }
  0x9e   :  { %832 = vmatpush.msra.mxu2 %v665_v38  ;;  %869 = vmatpush.msra.mxu3 %v3399_v22  ;;  %v5240_v22 = vand.u32 4294901760, %v3607_v33  ;;  %v105_v38 = vld [vmem:[#allocation2 + $0x120] sm:$0xff]  ;;  %v3642_v51 = vand.u32 4294901760, %v106_v31 }
  0x9f   :  { %925 = vmatpush.msrb.mxu1 %v924_v29  ;;  %718 = vmatpush.msra.mxu0 %v3353_v7  ;;  %v947_v7 = vsub.f32 %v3588_v59, %v5245_v58  ;;  %v3654_v62 = vand.u32 4294901760, %v105_v38  ;;  %v971_v29 = vsub.f32 %v3640_v43, %v5238_v19 }
  0xa0   :  { %836 = vmatpush.msra.mxu2 %v671_v8  ;;  %871 = vmatpush.msra.mxu3 %v3418_v6  ;;  %v942_v6 = vand.u32 4294901760, %v941_v40  ;;  %v5239_v8 = vand.u32 4294901760, %v3622_v54  ;;  %v3668_v2 = vsub.f32 %v106_v31, %v3642_v51 }
  0xa1   :  { %931 = vmatpush.msrb.mxu1 %v930_v24  ;;  %2943 = vmatmul.msk.f32.vlgmr.msra.gmra.mxu2 %vm37_vm1, %v5249_v25  ;;  %v948_v56 = vand.u32 4294901760, %v947_v7  ;;  %v3679_v61 = vsub.f32 %v105_v38, %v3654_v62  ;;  %v3693_v24 = vand.u32 4294901760, %v102_v16  ;;  %v972_v38 = vand.u32 4294901760, %v971_v29 }
  0xa2   :  { %1023 = vmatpush.msrb.mxu2 %v3532_v32  ;;  %721 = vmatpush.msra.mxu0 %v3421_v55  ;;  %v959_v55 = vsub.f32 %v3607_v33, %v5240_v22  ;;  %v965_v35 = vsub.f32 %v3622_v54, %v5239_v8  ;;  %v5236_v39 = vand.u32 4294901760, %v3668_v2  ;;  %v126_v8 = vld [vmem:[#allocation2 + $0x1c8] sm:$0xff]  ;;  %v125_v22 = vld [vmem:[#allocation2 + $0x1c0] sm:$0xff] }
  0xa3   :  { %873 = vmatpush.msra.mxu3 %v3425_v37  ;;  %937 = vmatpush.msrb.mxu1 %v936_v17  ;;  %v103_v37 = vld [vmem:[#allocation2 + $0x110] sm:$0xff]  ;;  %v5234_v40 = vand.u32 4294901760, %v3679_v61  ;;  %v3705_v17 = vand.u32 4294901760, %v101_v4  ;;  %v3715_v12 = vsub.f32 %v102_v16, %v3693_v24  ;;  %v3821_v42 = vand.u32 4294901760, %v125_v22 }
  0xa4   :  { %2944 = vmatmul.msk.f32.vlgmr.msra.gmra.mxu3 %vm37_vm1, %v5249_v25  ;;  %1026 = vmatpush.msrb.mxu2 %v3542_v60  ;;  %v3681_v63 = vand.u32 4294901760, %v103_v37  ;;  %v960_v49 = vand.u32 4294901760, %v959_v55  ;;  %v983_v7 = vsub.f32 %v3668_v2, %v5236_v39  ;;  %v128_v39 = vld [vmem:[#allocation2 + $0x1d8] sm:$0xff] }
  0xa5   :  { %1076 = vmatpush.msrb.mxu3 %v3514_v5  ;;  %724 = vmatpush.msra.mxu0 %v3428_v0  ;;  %v954_v0 = vand.u32 4294901760, %v953_v44  ;;  %v989_v55 = vsub.f32 %v3679_v61, %v5234_v40  ;;  %v3791_v19 = vand.u32 4294901760, %v128_v39  ;;  %v3844_v26 = vsub.f32 %v125_v22, %v3821_v42 }
  0xa6   :  { %943 = vmatpush.msrb.mxu1 %v942_v6  ;;  %1029 = vmatpush.msrb.mxu2 %v3553_v14  ;;  %v3703_v31 = vsub.f32 %v103_v37, %v3681_v63  ;;  %v5232_v6 = vand.u32 4294901760, %v3691_v53 }
  0xa7   :  { %1078 = vmatpush.msrb.mxu3 %v3521_v3  ;;  %52 = vperm.xlu1 %2974, %v5362_v34   ;;  %v3734_v34 = vpop.permute.xlu0 %43  ;;  %v990_v29 = vand.u32 4294901760, %v989_v55  ;;  %v130_v55 = vld [vmem:[#allocation2 + $0x1e8] sm:$0xff] }
  0xa8   :  { %727 = vmatpush.msra.mxu0 %v3436_v52  ;;  %949 = vmatpush.msrb.mxu1 %v948_v56  ;;  %v966_v52 = vand.u32 4294901760, %v965_v35  ;;  %v5231_v37 = vand.u32 4294901760, %v3703_v31  ;;  %v3725_v56 = vsub.f32 %v101_v4, %v3705_v17  ;;  %v984_v35 = vand.u32 4294901760, %v983_v7 }
  0xa9   :  { %730 = vmatmul.f32.vlgmr.msra.gmra.mxu0 %v3473_v11  ;;  %1032 = vmatpush.msrb.mxu2 %v3566_v28  ;;  %v977_v11 = vsub.f32 %v3652_v13, %v5237_v23  ;;  %v995_v16 = vsub.f32 %v3691_v53, %v5232_v6  ;;  %v3738_v4 = vand.u32 4294901760, %v132_v21  ;;  %vm45_vm2 = vcmp.eq.s32.totalorder %v3448_v9, %v3734_v34  ;;  %v147_v9 = vld [vmem:[#allocation2 + $0x270] sm:$0xff] }
  0xaa   :  { %880 = vmatpush.msrb.mxu0 %v3514_v5  ;;  %1080 = vmatpush.msrb.mxu3 %v3534_v15  ;;  %5363 = vst [vmem:[#allocation6_spill] sm:$0xff] %v3725_v56  ;;  %vm46_vm3 = vcmp.eq.s32.totalorder %v3453_v48, %v3734_v34  ;;  %v5264_v48 = vmov 3  }
  0xab   :  { %955 = vmatpush.msrb.mxu1 %v954_v0  ;;  %1035 = vmatpush.msrb.mxu2 %v3588_v59  ;;  %v978_v44 = vand.u32 4294901760, %v977_v11  ;;  %v5233_v0 = vand.u32 4294901760, %v3715_v12  ;;  %v5235_v11 = vand.u32 4294901760, %v3725_v56  ;;  %v996_v7 = vand.u32 4294901760, %v995_v16 }
  0xac   :  { %882 = vmatpush.msrb.mxu0 %v3521_v3  ;;  %1082 = vmatpush.msrb.mxu3 %v3546_v27 }
  0xad   :  { %961 = vmatpush.msrb.mxu1 %v960_v49  ;;  %1038 = vmatpush.msrb.mxu2 %v3602_v18  ;;  %v131_v49 = vld [vmem:[#allocation2 + $0x1f0] sm:$0xff]  ;;  %v1013_v16 = vsub.f32 %v3725_v56, %v5235_v11 }
  0xae   :  { %884 = vmatpush.msrb.mxu0 %v3534_v15  ;;  %1084 = vmatpush.msrb.mxu3 %v3561_v41 }
  0xaf   :  { %967 = vmatpush.msrb.mxu1 %v966_v52  ;;  %1041 = vmatpush.msrb.mxu2 %v3607_v33  ;;  %v1001_v52 = vsub.f32 %v3703_v31, %v5231_v37  ;;  %v3758_v37 = vsub.f32 %v132_v21, %v3738_v4  ;;  %v1014_v23 = vand.u32 4294901760, %v1013_v16 }
  0xb0   :  { %886 = vmatpush.msrb.mxu0 %v3546_v27  ;;  %1086 = vmatpush.msrb.mxu3 %v3575_v50 }
  0xb1   :  { %973 = vmatpush.msrb.mxu1 %v972_v38  ;;  %1044 = vmatpush.msrb.mxu2 %v3622_v54  ;;  %v3749_v38 = vand.u32 4294901760, %v131_v49  ;;  %v1002_v6 = vand.u32 4294901760, %v1001_v52  ;;  %v5244_v11 = vand.u32 4294901760, %v3758_v37 }
  0xb2   :  { %888 = vmatpush.msrb.mxu0 %v3561_v41  ;;  %1088 = vmatpush.msrb.mxu3 %v3579_v30 }
  0xb3   :  { %979 = vmatpush.msrb.mxu1 %v978_v44  ;;  %1047 = vmatpush.msrb.mxu2 %v3640_v43  ;;  %v1007_v44 = vsub.f32 %v3715_v12, %v5233_v0  ;;  %v3770_v0 = vand.u32 4294901760, %v130_v55  ;;  %v3773_v21 = vsub.f32 %v131_v49, %v3749_v38  ;;  %v1264_v16 = vsub.f32 %v3758_v37, %v5244_v11 }
  0xb4   :  { %890 = vmatpush.msrb.mxu0 %v3575_v50  ;;  %1090 = vmatpush.msrb.mxu3 %v3593_v45  ;;  %v3811_v11 = vand.u32 4294901760, %v126_v8 }
  0xb5   :  { %985 = vmatpush.msrb.mxu1 %v984_v35  ;;  %1050 = vmatpush.msrb.mxu2 %v3652_v13  ;;  %v2933_v35 = vsel %vm45_vm2, 1.0, %v5241_v10  ;;  %v1008_v52 = vand.u32 4294901760, %v1007_v44  ;;  %v3788_v44 = vsub.f32 %v130_v55, %v3770_v0 }
  0xb6   :  { %892 = vmatpush.msrb.mxu0 %v3579_v30  ;;  %1092 = vmatpush.msrb.mxu3 %v3613_v46  ;;  %v3778_v40 = vsub.f32 %v2933_v35, %v2933_v35  ;;  %v127_v35 = vld [vmem:[#allocation2 + $0x1d0] sm:$0xff]  ;;  %v3835_v25 = vsub.f32 %v126_v8, %v3811_v11 }
  0xb7   :  { %991 = vmatpush.msrb.mxu1 %v990_v29  ;;  %1053 = vmatpush.msrb.mxu2 %v3668_v2  ;;  %v129_v29 = vld [vmem:[#allocation2 + $0x1e0] sm:$0xff]  ;;  %v5253_v47 = vand.u32 4294901760, %v3788_v44 }
  0xb8   :  { %894 = vmatpush.msrb.mxu0 %v3593_v45  ;;  %1094 = vmatpush.msrb.mxu3 %v3626_v57  ;;  %v3782_v49 = vand.u32 4294901760, %v129_v29  ;;  %5367 = vst [vmem:[#allocation10_spill] sm:$0xff] %v3835_v25 }
  0xb9   :  { %997 = vmatpush.msrb.mxu1 %v996_v7  ;;  %1056 = vmatpush.msrb.mxu2 %v3679_v61  ;;  %v5247_v7 = vand.u32 4294901760, %v3773_v21 }
  0xba   :  { %896 = vmatpush.msrb.mxu0 %v3613_v46  ;;  %1096 = vmatpush.msrb.mxu3 %v3642_v51  ;;  %v3801_v55 = vsub.f32 %v129_v29, %v3782_v49  ;;  %v1265_v29 = vand.u32 4294901760, %v1264_v16  ;;  %v1276_v16 = vsub.f32 %v3788_v44, %v5253_v47  ;;  %v122_v47 = vld [vmem:[#allocation2 + $0x1a8] sm:$0xff] }
  0xbb   :  { %1003 = vmatpush.msrb.mxu1 %v1002_v6  ;;  %1059 = vmatpush.msrb.mxu2 %v3691_v53  ;;  %v913_v6 = vand.u32 4294901760, %v3778_v40  ;;  %v1270_v10 = vsub.f32 %v3773_v21, %v5247_v7  ;;  %v124_v7 = vld [vmem:[#allocation2 + $0x1b8] sm:$0xff]  ;;  %v3864_v8 = vand.u32 4294901760, %v122_v47 }
  0xbc   :  { %898 = vmatpush.msrb.mxu0 %v3626_v57  ;;  %1098 = vmatpush.msrb.mxu3 %v3654_v62  ;;  %5364 = vst [vmem:[#allocation7_spill] sm:$0xff] %v3801_v55  ;;  %v5255_v36 = vand.u32 4294901760, %v3801_v55 }
  0xbd   :  { %1009 = vmatpush.msrb.mxu1 %v1008_v52  ;;  %1062 = vmatpush.msrb.mxu2 %v3703_v31  ;;  %v3803_v52 = vand.u32 4294901760, %v127_v35  ;;  %v914_v58 = vsub.f32 %v3778_v40, %v913_v6 }
  0xbe   :  { %900 = vmatpush.msrb.mxu0 %v3642_v51  ;;  %1100 = vmatpush.msrb.mxu3 %v3670_v20 }
  0xbf   :  { %1015 = vmatpush.msrb.mxu1 %v1014_v23  ;;  %1065 = vmatpush.msrb.mxu2 %v3715_v12  ;;  %v3816_v23 = vsub.f32 %v128_v39, %v3791_v19  ;;  %v1271_v39 = vand.u32 4294901760, %v1270_v10  ;;  %v915_v10 = vand.u32 4294901760, %v914_v58  ;;  %v1277_v58 = vand.u32 4294901760, %v1276_v16 }
  0xc0   :  { %902 = vmatpush.msrb.mxu0 %v3654_v62  ;;  %1102 = vmatpush.msrb.mxu3 %v3681_v63  ;;  %v5369_v16 = vand.u32 4294901760, %v3532_v32  ;;  %v5372_v32 = vand.u32 4294901760, %v3542_v60 }
  0xc1   :  { %1184 = vmatpush.msra.mxu1 %v3514_v5  ;;  %5365 = vst [vmem:[#allocation8_spill] sm:$0xff] %v3816_v23  ;;  %1068 = vmatpush.msrb.mxu2 %v3725_v56  ;;  %v3827_v5 = vsub.f32 %v127_v35, %v3803_v52  ;;  %v3840_v35 = vand.u32 4294901760, %v124_v7 }
  0xc2   :  { %904 = vmatpush.msrb.mxu0 %v3670_v20  ;;  %1104 = vmatpush.msrb.mxu3 %v3693_v24 }
  0xc3   :  { %1186 = vmatpush.msra.mxu1 %v3521_v3  ;;  %5366 = vst [vmem:[#allocation9_spill] sm:$0xff] %v3827_v5  ;;  %1221 = vmatpush.msra.mxu2 %v3738_v4  ;;  %v3852_v3 = vand.u32 4294901760, %v123_v1 }
  0xc4   :  { %906 = vmatpush.msrb.mxu0 %v3681_v63  ;;  %1106 = vmatpush.msrb.mxu3 %v3705_v17 }
  0xc5   :  { %1188 = vmatpush.msra.mxu1 %v3534_v15  ;;  %1223 = vmatpush.msra.mxu2 %v3749_v38  ;;  %v1282_v15 = vsub.f32 %v3801_v55, %v5255_v36  ;;  %v3862_v36 = vsub.f32 %v124_v7, %v3840_v35  ;;  %v5370_v55 = vand.u32 4294901760, %v3827_v5  ;;  %v3874_v7 = vsub.f32 %v123_v1, %v3852_v3 }
  0xc6   :  { %1266 = vmatpush.msra.mxu3 %v1265_v29  ;;  %908 = vmatpush.msrb.mxu0 %v3693_v24  ;;  %v121_v29 = vld [vmem:[#allocation2 + $0x1a0] sm:$0xff]  ;;  %v3887_v1 = vsub.f32 %v122_v47, %v3864_v8 }
  0xc7   :  { %1190 = vmatpush.msra.mxu1 %v3546_v27  ;;  %1071 = vmatmul.f32.vlgmr.msrb.gmra.mxu2 %v3778_v40  ;;  %v5368_v27 = vand.u32 4294901760, %v3816_v23  ;;  %v1283_v22 = vand.u32 4294901760, %v1282_v15  ;;  %v5373_v40 = vmov 1.0   ;;  %v1317_v47 = vand.u32 4294901760, %v3874_v7 }
  0xc8   :  { %1272 = vmatpush.msra.mxu3 %v1271_v39  ;;  %1225 = vmatpush.msra.mxu2 %v3770_v0  ;;  %v120_v39 = vld [vmem:[#allocation2 + $0x198] sm:$0xff] }
  0xc9   :  { %910 = vmatpush.msrb.mxu0 %v3705_v17  ;;  %v1288_v56 = vsub.f32 %v3816_v23, %v5368_v27  ;;  %1192 = vmatpush.msra.mxu1 %v3561_v41  ;;  %v1294_v27 = vsub.f32 %v3827_v5, %v5370_v55  ;;  %v3876_v23 = vand.u32 4294901760, %v121_v29  ;;  %v5371_v41 = vand.u32 4294901760, %v3835_v25  ;;  %v117_v5 = vld [vmem:[#allocation2 + $0x180] sm:$0xff] }
  0xca   :  { %916 = vmatmul.f32.vlgmr.msrb.gmra.mxu0 %v915_v10  ;;  %1110 = vmatmul.f32.vlgmr.msrb.gmra.mxu3 %v913_v6  ;;  %v119_v10 = vld [vmem:[#allocation2 + $0x190] sm:$0xff]  ;;  %v5375_v55 = vand.u32 4294901760, %v3553_v14  ;;  %v5377_v14 = vand.u32 4294901760, %v3566_v28  ;;  %v5378_v28 = vand.u32 4294901760, %v3588_v59 }
  0xcb   :  { %1117 = vmatpush.msra.mxu0 %v5369_v16  ;;  %1227 = vmatpush.msra.mxu2 %v3782_v49  ;;  %v1300_v6 = vsub.f32 %v3835_v25, %v5371_v41  ;;  %v1289_v15 = vand.u32 4294901760, %v1288_v56  ;;  %v3889_v16 = vand.u32 4294901760, %v120_v39  ;;  %v1295_v56 = vand.u32 4294901760, %v1294_v27 }
  0xcc   :  { %1278 = vmatpush.msra.mxu3 %v1277_v58  ;;  %1194 = vmatpush.msra.mxu1 %v3575_v50  ;;  %v5374_v50 = vand.u32 4294901760, %v3844_v26  ;;  %v118_v58 = vld [vmem:[#allocation2 + $0x188] sm:$0xff]  ;;  %v3902_v41 = vsub.f32 %v121_v29, %v3876_v23  ;;  %v1323_v27 = vand.u32 4294901760, %v3887_v1 }
  0xcd   :  { %1121 = vmatpush.msra.mxu0 %v5372_v32  ;;  %2945 = vmatmul.msk.f32.vlgmr.msrb.gmra.mxu1 %vm45_vm2, %v5373_v40  ;;  %v3904_v32 = vand.u32 4294901760, %v119_v10  ;;  %v1301_v25 = vand.u32 4294901760, %v1300_v6  ;;  %v3915_v29 = vsub.f32 %v120_v39, %v3889_v16 }
  0xce   :  { %1229 = vmatpush.msra.mxu2 %v3791_v19  ;;  %v1306_v60 = vsub.f32 %v3844_v26, %v5374_v50  ;;  %1284 = vmatpush.msra.mxu3 %v1283_v22  ;;  %v3917_v50 = vand.u32 4294901760, %v118_v58 }
  0xcf   :  { %1196 = vmatpush.msra.mxu1 %v3579_v30  ;;  %1125 = vmatpush.msra.mxu0 %v5375_v55  ;;  %v5376_v30 = vand.u32 4294901760, %v3862_v36  ;;  %v3928_v39 = vsub.f32 %v119_v10, %v3904_v32  ;;  %v3930_v55 = vand.u32 4294901760, %v117_v5  ;;  %v1335_v10 = vand.u32 4294901760, %v3915_v29 }
  0xd0   :  { %1231 = vmatpush.msra.mxu2 %v3803_v52  ;;  %1290 = vmatpush.msra.mxu3 %v1289_v15  ;;  %v1307_v6 = vand.u32 4294901760, %v1306_v60  ;;  %v1329_v15 = vand.u32 4294901760, %v3902_v41  ;;  %v1324_v60 = vsub.f32 %v3887_v1, %v1323_v27 }
  0xd1   :  { %1198 = vmatpush.msra.mxu1 %v3593_v45  ;;  %v1312_v22 = vsub.f32 %v3862_v36, %v5376_v30  ;;  %1129 = vmatpush.msra.mxu0 %v5377_v14  ;;  %v1318_v45 = vsub.f32 %v3874_v7, %v1317_v47  ;;  %v5379_v30 = vand.u32 4294901760, %v3602_v18  ;;  %v5381_v14 = vand.u32 4294901760, %v3607_v33 }
  0xd2   :  { %1233 = vmatpush.msra.mxu2 %v3811_v11  ;;  %1296 = vmatpush.msra.mxu3 %v1295_v56  ;;  %v3943_v56 = vsub.f32 %v118_v58, %v3917_v50  ;;  %v1330_v59 = vsub.f32 %v3902_v41, %v1329_v15  ;;  %v5380_v58 = vmov 0.0  }
  0xd3   :  { %1200 = vmatpush.msra.mxu1 %v3613_v46  ;;  %1133 = vmatpush.msra.mxu0 %v5378_v28  ;;  %v1313_v46 = vand.u32 4294901760, %v1312_v22  ;;  %v3954_v22 = vsub.f32 %v117_v5, %v3930_v55  ;;  %v2934_v18 = vsel %vm46_vm3, 1.0, %v5380_v58 }
  0xd4   :  { %1235 = vmatpush.msra.mxu2 %v3821_v42  ;;  %1302 = vmatpush.msra.mxu3 %v1301_v25  ;;  %v1319_v25 = vand.u32 4294901760, %v1318_v45  ;;  %v1347_v5 = vand.u32 4294901760, %v3943_v56  ;;  %v5382_v45 = vand.u32 4294901760, %v3622_v54  ;;  %v3971_v28 = vsub.f32 %v2934_v18, %v2934_v18 }
  0xd5   :  { %1202 = vmatpush.msra.mxu1 %v3626_v57  ;;  %1137 = vmatpush.msra.mxu0 %v5379_v30  ;;  %v1341_v57 = vand.u32 4294901760, %v3928_v39  ;;  %v1331_v33 = vand.u32 4294901760, %v1330_v59  ;;  %v5384_v30 = vand.u32 4294901760, %v3652_v13  ;;  %v5385_v59 = vand.u32 4294901760, %v3668_v2 }
  0xd6   :  { %1237 = vmatpush.msra.mxu2 %v3840_v35  ;;  %1308 = vmatpush.msra.mxu3 %v1307_v6  ;;  %v1336_v6 = vsub.f32 %v3915_v29, %v1335_v10  ;;  %v5386_v18 = vand.u32 4294901760, %v3679_v61  ;;  %v5388_v61 = vand.u32 4294901760, %v3758_v37 }
  0xd7   :  { %1204 = vmatpush.msra.mxu1 %v3642_v51  ;;  %1141 = vmatpush.msra.mxu0 %v5381_v14  ;;  %v1325_v51 = vand.u32 4294901760, %v1324_v60  ;;  %v5383_v60 = vand.u32 4294901760, %v3640_v43  ;;  %v5389_v14 = vand.u32 4294901760, %v3703_v31  ;;  %v5392_v31 = vand.u32 4294901760, %v3788_v44 }
  0xd8   :  { %1239 = vmatpush.msra.mxu2 %v3852_v3  ;;  %1314 = vmatpush.msra.mxu3 %v1313_v46  ;;  %v1353_v46 = vand.u32 4294901760, %v3954_v22  ;;  %v1337_v54 = vand.u32 4294901760, %v1336_v6  ;;  %v5391_v6 = vand.u32 4294901760, %v3715_v12  ;;  %v5395_v12 = vld [vmem:[#allocation7_spill] sm:$0xff] }
  0xd9   :  { %1206 = vmatpush.msra.mxu1 %v3654_v62  ;;  %1145 = vmatpush.msra.mxu0 %v5382_v45  ;;  %v1342_v62 = vsub.f32 %v3928_v39, %v1341_v57  ;;  %v5393_v45 = vld [vmem:[#allocation6_spill] sm:$0xff] }
  0xda   :  { %1241 = vmatpush.msra.mxu2 %v3864_v8  ;;  %1320 = vmatpush.msra.mxu3 %v1319_v25  ;;  %v1254_v25 = vand.u32 4294901760, %v3971_v28 }
  0xdb   :  { %1208 = vmatpush.msra.mxu1 %v3670_v20  ;;  %1149 = vmatpush.msra.mxu0 %v5383_v60  ;;  %v1348_v20 = vsub.f32 %v3943_v56, %v1347_v5  ;;  %v1343_v43 = vand.u32 4294901760, %v1342_v62  ;;  %v5397_v62 = vld [vmem:[#allocation8_spill] sm:$0xff] }
  0xdc   :  { %1243 = vmatpush.msra.mxu2 %v3876_v23  ;;  %1326 = vmatpush.msra.mxu3 %v1325_v51  ;;  %v1255_v2 = vsub.f32 %v3971_v28, %v1254_v25  ;;  %v5398_v60 = vand.u32 4294901760, %v5397_v62 }
  0xdd   :  { %1210 = vmatpush.msra.mxu1 %v3681_v63  ;;  %1153 = vmatpush.msra.mxu0 %v5384_v30  ;;  %v1354_v63 = vsub.f32 %v3954_v22, %v1353_v46  ;;  %v1349_v13 = vand.u32 4294901760, %v1348_v20 }
  0xde   :  { %1245 = vmatpush.msra.mxu2 %v3889_v16  ;;  %1332 = vmatpush.msra.mxu3 %v1331_v33  ;;  %v1256_v51 = vand.u32 4294901760, %v1255_v2  ;;  %v5394_v33 = vand.u32 4294901760, %v5393_v45 }
  0xdf   :  { %1212 = vmatpush.msra.mxu1 %v3693_v24  ;;  %1157 = vmatpush.msra.mxu0 %v5385_v59  ;;  %v1355_v24 = vand.u32 4294901760, %v1354_v63  ;;  %v145_v63 = vld [vmem:[#allocation2 + $0x260] sm:$0xff] }
  0xe0   :  { %1247 = vmatpush.msra.mxu2 %v3904_v32  ;;  %1338 = vmatpush.msra.mxu3 %v1337_v54 }
  0xe1   :  { %1214 = vmatpush.msra.mxu1 %v3705_v17  ;;  %1161 = vmatpush.msra.mxu0 %v5386_v18  ;;  %v5387_v17 = vand.u32 4294901760, %v3691_v53  ;;  %v5390_v53 = vand.u32 4294901760, %v3773_v21  ;;  %v144_v18 = vld [vmem:[#allocation2 + $0x258] sm:$0xff] }
  0xe2   :  { %2947 = vmatmul.msk.f32.vlgmr.msra.gmra.mxu1 %vm45_vm2, %v5373_v40  ;;  %1249 = vmatpush.msra.mxu2 %v3917_v50 }
  0xe3   :  { %1344 = vmatpush.msra.mxu3 %v1343_v43  ;;  %1417 = vmatpush.msrb.mxu1 %v3738_v4 }
  0xe4   :  { %1165 = vmatpush.msra.mxu0 %v5387_v17  ;;  %1251 = vmatpush.msra.mxu2 %v3930_v55  ;;  %v4094_v17 = vand.u32 4294901760, %v144_v18 }
  0xe5   :  { %1350 = vmatpush.msra.mxu3 %v1349_v13  ;;  %1419 = vmatpush.msrb.mxu1 %v3749_v38  ;;  %v4079_v13 = vand.u32 4294901760, %v145_v63 }
  0xe6   :  { %1458 = vmatpush.msrb.mxu2 %v5388_v61  ;;  %1169 = vmatpush.msra.mxu0 %v5389_v14  ;;  %v141_v14 = vld [vmem:[#allocation2 + $0x240] sm:$0xff] }
  0xe7   :  { %1356 = vmatpush.msra.mxu3 %v1355_v24  ;;  %1421 = vmatpush.msrb.mxu1 %v3770_v0  ;;  %v4099_v61 = vsub.f32 %v145_v63, %v4079_v13  ;;  %v134_v63 = vld [vmem:[#allocation2 + $0x208] sm:$0xff] }
  0xe8   :  { %2948 = vmatmul.msk.f32.vlgmr.msra.gmra.mxu3 %vm46_vm3, %v5373_v40  ;;  %1462 = vmatpush.msrb.mxu2 %v5390_v53  ;;  %v140_v53 = vld [vmem:[#allocation2 + $0x238] sm:$0xff] }
  0xe9   :  { %1525 = vmatpush.msrb.mxu3 %v3738_v4  ;;  %1173 = vmatpush.msra.mxu0 %v5391_v6  ;;  %v5396_v4 = vand.u32 4294901760, %v5395_v12  ;;  %v4146_v45 = vand.u32 4294901760, %v140_v53 }
  0xea   :  { %1423 = vmatpush.msrb.mxu1 %v3782_v49  ;;  %1257 = vmatmul.f32.vlgmr.msra.gmra.mxu2 %v1256_v51  ;;  %v4126_v51 = vand.u32 4294901760, %v141_v14 }
  0xeb   :  { %1527 = vmatpush.msrb.mxu3 %v3749_v38  ;;  %1466 = vmatpush.msrb.mxu2 %v5392_v31  ;;  %v148_v38 = vld [vmem:[#allocation2 + $0x278] sm:$0xff]  ;;  %v139_v31 = vld [vmem:[#allocation2 + $0x230] sm:$0xff] }
  0xec   :  { %1177 = vmatpush.msra.mxu0 %v5394_v33  ;;  %1425 = vmatpush.msrb.mxu1 %v3791_v19  ;;  %v4050_v20 = vand.u32 4294901760, %v148_v38  ;;  %v4155_v33 = vsub.f32 %v141_v14, %v4126_v51  ;;  %v133_v14 = vld [vmem:[#allocation2 + $0x200] sm:$0xff] }
  0xed   :  { %2946 = vmatmul.msk.f32.vlgmr.msra.gmra.mxu0 %vm45_vm2, %v5373_v40  ;;  %1470 = vmatpush.msrb.mxu2 %v5396_v4  ;;  %v4159_v4 = vand.u32 4294901760, %v139_v31 }
  0xee   :  { %1364 = vmatpush.msrb.mxu0 %v3758_v37  ;;  %1529 = vmatpush.msrb.mxu3 %v3770_v0  ;;  %v5399_v37 = vld [vmem:[#allocation9_spill] sm:$0xff]  ;;  %v146_v0 = vld [vmem:[#allocation2 + $0x268] sm:$0xff] }
  0xef   :  { %1427 = vmatpush.msrb.mxu1 %v3803_v52  ;;  %1474 = vmatpush.msrb.mxu2 %v5398_v60  ;;  %v5400_v54 = vand.u32 4294901760, %v5399_v37  ;;  %v4067_v43 = vand.u32 4294901760, %v146_v0  ;;  %v136_v60 = vld [vmem:[#allocation2 + $0x218] sm:$0xff] }
  0xf0   :  { %1367 = vmatpush.msrb.mxu0 %v3773_v21  ;;  %1531 = vmatpush.msrb.mxu3 %v3782_v49  ;;  %v5401_v21 = vld [vmem:[#allocation10_spill] sm:$0xff]  ;;  %v4057_v49 = vand.u32 4294901760, %v147_v9 }
  0xf1   :  { %1429 = vmatpush.msrb.mxu1 %v3811_v11  ;;  %1478 = vmatpush.msrb.mxu2 %v5400_v54  ;;  %v5402_v30 = vand.u32 4294901760, %v5401_v21  ;;  %v4086_v24 = vsub.f32 %v146_v0, %v4067_v43 }
  0xf2   :  { %1370 = vmatpush.msrb.mxu0 %v3788_v44  ;;  %1533 = vmatpush.msrb.mxu3 %v3791_v19  ;;  %v5403_v44 = vand.u32 4294901760, %v3844_v26  ;;  %v4065_v19 = vsub.f32 %v148_v38, %v4050_v20  ;;  %v4075_v59 = vsub.f32 %v147_v9, %v4057_v49  ;;  %v4173_v38 = vsub.f32 %v140_v53, %v4146_v45 }
  0xf3   :  { %1431 = vmatpush.msrb.mxu1 %v3821_v42  ;;  %1482 = vmatpush.msrb.mxu2 %v5402_v30 }
  0xf4   :  { %1373 = vmatpush.msrb.mxu0 %v5395_v12  ;;  %1535 = vmatpush.msrb.mxu3 %v3803_v52  ;;  %v5404_v52 = vand.u32 4294901760, %v3862_v36  ;;  %v5281_v2 = vand.u32 4294901760, %v4075_v59 }
  0xf5   :  { %1433 = vmatpush.msrb.mxu1 %v3840_v35  ;;  %1486 = vmatpush.msrb.mxu2 %v5403_v44  ;;  %v4203_v44 = vand.u32 4294901760, %v136_v60 }
  0xf6   :  { %1376 = vmatpush.msrb.mxu0 %v5397_v62  ;;  %1537 = vmatpush.msrb.mxu3 %v3811_v11  ;;  %v5282_v11 = vand.u32 4294901760, %v4065_v19 }
  0xf7   :  { %1435 = vmatpush.msrb.mxu1 %v3852_v3  ;;  %1490 = vmatpush.msrb.mxu2 %v5404_v52 }
  0xf8   :  { %1379 = vmatpush.msrb.mxu0 %v5399_v37  ;;  %1539 = vmatpush.msrb.mxu3 %v3821_v42  ;;  %v143_v42 = vld [vmem:[#allocation2 + $0x250] sm:$0xff]  ;;  %v4185_v37 = vsub.f32 %v139_v31, %v4159_v4 }
  0xf9   :  { %1437 = vmatpush.msrb.mxu1 %v3864_v8  ;;  %1494 = vmatpush.msrb.mxu2 %v1317_v47  ;;  %v142_v47 = vld [vmem:[#allocation2 + $0x248] sm:$0xff] }
  0xfa   :  { %1382 = vmatpush.msrb.mxu0 %v5401_v21  ;;  %1541 = vmatpush.msrb.mxu3 %v3840_v35  ;;  %v5280_v35 = vand.u32 4294901760, %v4086_v24  ;;  %v5272_v21 = vand.u32 4294901760, %v4173_v38  ;;  %v5271_v52 = vand.u32 4294901760, %v4185_v37 }
  0xfb   :  { %1439 = vmatpush.msrb.mxu1 %v3876_v23  ;;  %1498 = vmatpush.msrb.mxu2 %v1323_v27  ;;  %v4108_v27 = vand.u32 4294901760, %v143_v42 }
  0xfc   :  { %1385 = vmatpush.msrb.mxu0 %v3844_v26  ;;  %1543 = vmatpush.msrb.mxu3 %v3852_v3  ;;  %v1605_v26 = vsub.f32 %v4065_v19, %v5282_v11  ;;  %v4112_v3 = vand.u32 4294901760, %v142_v47  ;;  %v155_v11 = vld [vmem:[#allocation2 + $0x2b0] sm:$0xff] }
  0xfd   :  { %1441 = vmatpush.msrb.mxu1 %v3889_v16  ;;  %1502 = vmatpush.msrb.mxu2 %v1329_v15  ;;  %v4121_v15 = vsub.f32 %v144_v18, %v4094_v17  ;;  %v4135_v6 = vsub.f32 %v143_v42, %v4108_v27 }
  0xfe   :  { %1388 = vmatpush.msrb.mxu0 %v3862_v36  ;;  %1545 = vmatpush.msrb.mxu3 %v3864_v8  ;;  %v1611_v36 = vsub.f32 %v4075_v59, %v5281_v2  ;;  %v5278_v8 = vand.u32 4294901760, %v4099_v61 }
  0xff   :  { %1443 = vmatpush.msrb.mxu1 %v3904_v32  ;;  %1506 = vmatpush.msrb.mxu2 %v1335_v10  ;;  %v1617_v10 = vsub.f32 %v4086_v24, %v5280_v35  ;;  %v5276_v12 = vand.u32 4294901760, %v4135_v6 }
 0x100   :  { %1391 = vmatpush.msrb.mxu0 %v3874_v7  ;;  %1547 = vmatpush.msrb.mxu3 %v3876_v23  ;;  %v1606_v7 = vand.u32 4294901760, %v1605_v26  ;;  %v4140_v23 = vsub.f32 %v142_v47, %v4112_v3  ;;  %v2977_v47 = vld [vmem:[%s5197_s0] sm:$0xff] }
 0x101   :  { %1445 = vmatpush.msrb.mxu1 %v3917_v50  ;;  %1510 = vmatpush.msrb.mxu2 %v1341_v57  ;;  %v5277_v57 = vand.u32 4294901760, %v4121_v15  ;;  %v1635_v9 = vsub.f32 %v4135_v6, %v5276_v12 }
 0x102   :  { %1394 = vmatpush.msrb.mxu0 %v3887_v1  ;;  %1549 = vmatpush.msrb.mxu3 %v3889_v16  ;;  %v1612_v1 = vand.u32 4294901760, %v1611_v36  ;;  %v1623_v16 = vsub.f32 %v4099_v61, %v5278_v8  ;;  %v1653_v36 = vsub.f32 %v4173_v38, %v5272_v21  ;;  %v158_v21 = vld [vmem:[#allocation2 + $0x2c8] sm:$0xff] }
 0x103   :  { %1447 = vmatpush.msrb.mxu1 %v3930_v55  ;;  %1514 = vmatpush.msrb.mxu2 %v1347_v5  ;;  %v137_v5 = vld [vmem:[#allocation2 + $0x220] sm:$0xff]  ;;  %v4352_v12 = vand.u32 4294901760, %v158_v21 }
 0x104   :  { %1397 = vmatpush.msrb.mxu0 %v3902_v41  ;;  %1451 = vmatmul.f32.vlgmr.msrb.gmra.mxu1 %v1254_v25  ;;  %v138_v41 = vld [vmem:[#allocation2 + $0x228] sm:$0xff]  ;;  %v1618_v25 = vand.u32 4294901760, %v1617_v10  ;;  %v4187_v54 = vand.u32 4294901760, %v137_v5  ;;  %v4229_v10 = vand.u32 4294901760, %v134_v63 }
 0x105   :  { %1551 = vmatpush.msrb.mxu3 %v3904_v32  ;;  %1607 = vmatpush.msra.mxu1 %v1606_v7  ;;  %v5274_v32 = vand.u32 4294901760, %v4140_v23  ;;  %v4175_v62 = vand.u32 4294901760, %v138_v41  ;;  %v4227_v7 = vsub.f32 %v136_v60, %v4203_v44  ;;  %v4376_v2 = vsub.f32 %v158_v21, %v4352_v12 }
 0x106   :  { %1400 = vmatpush.msrb.mxu0 %v3915_v29  ;;  %1518 = vmatpush.msrb.mxu2 %v1353_v46  ;;  %v1629_v29 = vsub.f32 %v4121_v15, %v5277_v57  ;;  %v5273_v46 = vand.u32 4294901760, %v4155_v33  ;;  %v4213_v18 = vsub.f32 %v137_v5, %v4187_v54 }
 0x107   :  { %1553 = vmatpush.msrb.mxu3 %v3917_v50  ;;  %1613 = vmatpush.msra.mxu1 %v1612_v1  ;;  %v1624_v50 = vand.u32 4294901760, %v1623_v16  ;;  %v4201_v30 = vsub.f32 %v138_v41, %v4175_v62  ;;  %v4241_v16 = vand.u32 4294901760, %v133_v14  ;;  %v1654_v41 = vand.u32 4294901760, %v1653_v36  ;;  %5409 = vst [vmem:[#allocation9_spill] sm:$0xff] %v4376_v2 }
 0x108   :  { %2949 = vmatmul.msk.f32.vlgmr.msrb.gmra.mxu2 %vm46_vm3, %v5373_v40  ;;  %1403 = vmatpush.msrb.mxu0 %v3928_v39  ;;  %v1641_v39 = vsub.f32 %v4140_v23, %v5274_v32  ;;  %v1630_v0 = vand.u32 4294901760, %v1629_v29  ;;  %v1647_v34 = vsub.f32 %v4155_v33, %v5273_v46  ;;  %v5269_v31 = vand.u32 4294901760, %v4213_v18  ;;  %v157_v46 = vld [vmem:[#allocation2 + $0x2c0] sm:$0xff] }
 0x109   :  { %1705 = vmatpush.msra.mxu2 %v4065_v19  ;;  %1555 = vmatpush.msrb.mxu3 %v3930_v55  ;;  %v135_v55 = vld [vmem:[#allocation2 + $0x210] sm:$0xff]  ;;  %v5270_v53 = vand.u32 4294901760, %v4201_v30  ;;  %v5267_v5 = vand.u32 4294901760, %v4227_v7  ;;  %v4251_v29 = vsub.f32 %v134_v63, %v4229_v10  ;;  %v4362_v8 = vand.u32 4294901760, %v157_v46 }
 0x10a   :  { %1619 = vmatpush.msra.mxu1 %v1618_v25  ;;  %2950 = vmatmul.msk.f32.vlgmr.msrb.gmra.mxu3 %vm46_vm3, %v5373_v40  ;;  %v4215_v42 = vand.u32 4294901760, %v135_v55  ;;  %v1642_v26 = vand.u32 4294901760, %v1641_v39  ;;  %v1671_v60 = vsub.f32 %v4213_v18, %v5269_v31  ;;  %v4261_v39 = vsub.f32 %v133_v14, %v4241_v16  ;;  %v160_v31 = vld [vmem:[#allocation2 + $0x2d8] sm:$0xff] }
 0x10b   :  { %1708 = vmatpush.msra.mxu2 %v4075_v59  ;;  %1758 = vmatpush.msra.mxu3 %v4050_v20  ;;  %v1665_v25 = vsub.f32 %v4201_v30, %v5270_v53  ;;  %v5266_v63 = vand.u32 4294901760, %v4251_v29  ;;  %v4385_v35 = vsub.f32 %v157_v46, %v4362_v8 }
 0x10c   :  { %1406 = vmatpush.msrb.mxu0 %v3943_v56  ;;  %1625 = vmatpush.msra.mxu1 %v1624_v50  ;;  %v1636_v56 = vand.u32 4294901760, %v1635_v9  ;;  %v4239_v1 = vsub.f32 %v135_v55, %v4215_v42  ;;  %5405 = vst [vmem:[#allocation5_spill] sm:$0xff] %v4261_v39  ;;  %v164_v55 = vld [vmem:[#allocation2 + $0x2f8] sm:$0xff] }
 0x10d   :  { %2975 = vset.pattern.permute.xlu1 %v5264_v48  ;;  %1711 = vmatpush.msra.mxu2 %v4086_v24 }
 0x10e   :  { %1760 = vmatpush.msra.mxu3 %v4057_v49  ;;  %61 = vperm.xlu1 %2975, %v2977_v47   ;;  %v5265_v9 = vand.u32 4294901760, %v4239_v1  ;;  %v4272_v47 = vand.u32 4294901760, %v164_v55 }
 0x10f   :  { %1409 = vmatpush.msrb.mxu0 %v3954_v22  ;;  %1631 = vmatpush.msra.mxu1 %v1630_v0  ;;  %v1648_v22 = vand.u32 4294901760, %v1647_v34  ;;  %v1666_v0 = vand.u32 4294901760, %v1665_v25  ;;  %v1677_v34 = vsub.f32 %v4227_v7, %v5267_v5 }
 0x110   :  { %1412 = vmatmul.f32.vlgmr.msrb.gmra.mxu0 %v3971_v28  ;;  %1714 = vmatpush.msra.mxu2 %v4099_v61  ;;  %v1659_v28 = vsub.f32 %v4185_v37, %v5271_v52  ;;  %v1683_v14 = vsub.f32 %v4239_v1, %v5265_v9  ;;  %v4299_v48 = vsub.f32 %v164_v55, %v4272_v47  ;;  %v4332_v52 = vand.u32 4294901760, %v160_v31 }
 0x111   :  { %1562 = vmatpush.msra.mxu0 %v4050_v20  ;;  %1762 = vmatpush.msra.mxu3 %v4067_v43  ;;  %v1678_v25 = vand.u32 4294901760, %v1677_v34 }
 0x112   :  { %1637 = vmatpush.msra.mxu1 %v1636_v56  ;;  %1717 = vmatpush.msra.mxu2 %v4121_v15  ;;  %v1660_v50 = vand.u32 4294901760, %v1659_v28  ;;  %v163_v56 = vld [vmem:[#allocation2 + $0x2f0] sm:$0xff]  ;;  %v4286_v28 = vld [vmem:[%s5198_s1] sm:$0xff]  ;;  %v1684_v9 = vand.u32 4294901760, %v1683_v14 }
 0x113   :  { %1564 = vmatpush.msra.mxu0 %v4057_v49  ;;  %1764 = vmatpush.msra.mxu3 %v4079_v13 }
 0x114   :  { %1643 = vmatpush.msra.mxu1 %v1642_v26  ;;  %1720 = vmatpush.msra.mxu2 %v4135_v6  ;;  %v1672_v26 = vand.u32 4294901760, %v1671_v60  ;;  %v162_v60 = vld [vmem:[#allocation2 + $0x2e8] sm:$0xff] }
 0x115   :  { %1566 = vmatpush.msra.mxu0 %v4067_v43  ;;  %1766 = vmatpush.msra.mxu3 %v4094_v17 }
 0x116   :  { %1649 = vmatpush.msra.mxu1 %v1648_v22  ;;  %1723 = vmatpush.msra.mxu2 %v4140_v23  ;;  %v5268_v22 = vand.u32 4294901760, %v4261_v39 }
 0x117   :  { %1568 = vmatpush.msra.mxu0 %v4079_v13  ;;  %1768 = vmatpush.msra.mxu3 %v4108_v27 }
 0x118   :  { %1655 = vmatpush.msra.mxu1 %v1654_v41  ;;  %1726 = vmatpush.msra.mxu2 %v4155_v33  ;;  %v4290_v41 = vand.u32 4294901760, %v163_v56  ;;  %v1695_v34 = vsub.f32 %v4261_v39, %v5268_v22  ;;  %v5275_v22 = vand.u32 4294901760, %v4299_v48 }
 0x119   :  { %1570 = vmatpush.msra.mxu0 %v4094_v17  ;;  %1770 = vmatpush.msra.mxu3 %v4112_v3  ;;  %v4278_v36 = vpop.permute.xlu1 %52 }
 0x11a   :  { %1661 = vmatpush.msra.mxu1 %v1660_v50  ;;  %1729 = vmatpush.msra.mxu2 %v4173_v38  ;;  %vm54_vm4 = vcmp.eq.s32.totalorder %v4286_v28, %v4278_v36  ;;  %v1689_v50 = vsub.f32 %v4251_v29, %v5266_v63  ;;  %v4311_v63 = vand.u32 4294901760, %v162_v60  ;;  %v4314_v55 = vsub.f32 %v163_v56, %v4290_v41 }
 0x11b   :  { %1572 = vmatpush.msra.mxu0 %v4108_v27  ;;  %1772 = vmatpush.msra.mxu3 %v4126_v51  ;;  %v1696_v53 = vand.u32 4294901760, %v1695_v34 }
 0x11c   :  { %1667 = vmatpush.msra.mxu1 %v1666_v0  ;;  %1732 = vmatpush.msra.mxu2 %v4185_v37  ;;  %v2935_v0 = vsel %vm54_vm4, 1.0, %v5380_v58  ;;  %v1690_v14 = vand.u32 4294901760, %v1689_v50  ;;  %v4329_v50 = vsub.f32 %v162_v60, %v4311_v63 }
 0x11d   :  { %1574 = vmatpush.msra.mxu0 %v4112_v3  ;;  %1774 = vmatpush.msra.mxu3 %v4146_v45  ;;  %v4319_v5 = vsub.f32 %v2935_v0, %v2935_v0  ;;  %v159_v0 = vld [vmem:[#allocation2 + $0x2d0] sm:$0xff] }
 0x11e   :  { %1673 = vmatpush.msra.mxu1 %v1672_v26  ;;  %1735 = vmatpush.msra.mxu2 %v4201_v30  ;;  %v161_v26 = vld [vmem:[#allocation2 + $0x2e0] sm:$0xff]  ;;  %5406 = vst [vmem:[#allocation6_spill] sm:$0xff] %v4329_v50 }
 0x11f   :  { %1576 = vmatpush.msra.mxu0 %v4126_v51  ;;  %1776 = vmatpush.msra.mxu3 %v4159_v4  ;;  %v4323_v56 = vand.u32 4294901760, %v161_v26  ;;  %v1595_v34 = vand.u32 4294901760, %v4319_v5 }
 0x120   :  { %1679 = vmatpush.msra.mxu1 %v1678_v25  ;;  %1738 = vmatpush.msra.mxu2 %v4213_v18  ;;  %v5279_v25 = vand.u32 4294901760, %v4314_v55 }
 0x121   :  { %1578 = vmatpush.msra.mxu0 %v4146_v45  ;;  %1778 = vmatpush.msra.mxu3 %v4175_v62  ;;  %v4342_v60 = vsub.f32 %v161_v26, %v4323_v56  ;;  %v1596_v57 = vsub.f32 %v4319_v5, %v1595_v34 }
 0x122   :  { %1685 = vmatpush.msra.mxu1 %v1684_v9  ;;  %1741 = vmatpush.msra.mxu2 %v4227_v7  ;;  %v1946_v9 = vsub.f32 %v4299_v48, %v5275_v22  ;;  %v1952_v32 = vsub.f32 %v4314_v55, %v5279_v25  ;;  %v5283_v22 = vand.u32 4294901760, %v4329_v50  ;;  %v156_v25 = vld [vmem:[#allocation2 + $0x2b8] sm:$0xff] }
 0x123   :  { %1580 = vmatpush.msra.mxu0 %v4159_v4  ;;  %1780 = vmatpush.msra.mxu3 %v4187_v54  ;;  %5407 = vst [vmem:[#allocation7_spill] sm:$0xff] %v4342_v60  ;;  %v5410_v21 = vand.u32 4294901760, %v4342_v60 }
 0x124   :  { %1691 = vmatpush.msra.mxu1 %v1690_v14  ;;  %1744 = vmatpush.msra.mxu2 %v4239_v1  ;;  %v4344_v14 = vand.u32 4294901760, %v159_v0  ;;  %v1947_v26 = vand.u32 4294901760, %v1946_v9  ;;  %v1958_v9 = vsub.f32 %v4329_v50, %v5283_v22  ;;  %v154_v22 = vld [vmem:[#allocation2 + $0x2a8] sm:$0xff] }
 0x125   :  { %1582 = vmatpush.msra.mxu0 %v4175_v62  ;;  %1782 = vmatpush.msra.mxu3 %v4203_v44 }
 0x126   :  { %1697 = vmatpush.msra.mxu1 %v1696_v53  ;;  %1747 = vmatpush.msra.mxu2 %v4251_v29  ;;  %v4357_v53 = vsub.f32 %v160_v31, %v4332_v52  ;;  %v1953_v31 = vand.u32 4294901760, %v1952_v32  ;;  %v1597_v32 = vand.u32 4294901760, %v1596_v57  ;;  %v1959_v57 = vand.u32 4294901760, %v1958_v9 }
 0x127   :  { %1584 = vmatpush.msra.mxu0 %v4187_v54  ;;  %1784 = vmatpush.msra.mxu3 %v4215_v42  ;;  %v5412_v9 = vand.u32 4294901760, %v4065_v19  ;;  %v5415_v19 = vand.u32 4294901760, %v4075_v59 }
 0x128   :  { %1866 = vmatpush.msrb.mxu1 %v4050_v20  ;;  %5408 = vst [vmem:[#allocation8_spill] sm:$0xff] %v4357_v53  ;;  %1750 = vmatpush.msra.mxu2 %v4261_v39  ;;  %v4368_v20 = vsub.f32 %v159_v0, %v4344_v14  ;;  %v4381_v0 = vand.u32 4294901760, %v156_v25  ;;  %v4393_v39 = vand.u32 4294901760, %v155_v11 }
 0x129   :  { %1586 = vmatpush.msra.mxu0 %v4203_v44  ;;  %1786 = vmatpush.msra.mxu3 %v4229_v10 }
 0x12a   :  { %1868 = vmatpush.msrb.mxu1 %v4057_v49  ;;  %1903 = vmatpush.msrb.mxu2 %v4272_v47  ;;  %v4405_v49 = vand.u32 4294901760, %v154_v22 }
 0x12b   :  { %1588 = vmatpush.msra.mxu0 %v4215_v42  ;;  %1788 = vmatpush.msra.mxu3 %v4241_v16 }
 0x12c   :  { %1870 = vmatpush.msrb.mxu1 %v4067_v43  ;;  %1905 = vmatpush.msrb.mxu2 %v4290_v41  ;;  %v1964_v43 = vsub.f32 %v4342_v60, %v5410_v21  ;;  %v4403_v21 = vsub.f32 %v156_v25, %v4381_v0  ;;  %v5413_v60 = vand.u32 4294901760, %v4368_v20  ;;  %v4415_v25 = vsub.f32 %v155_v11, %v4393_v39 }
 0x12d   :  { %1948 = vmatpush.msrb.mxu3 %v1947_v26  ;;  %1590 = vmatpush.msra.mxu0 %v4229_v10  ;;  %v153_v26 = vld [vmem:[#allocation2 + $0x2a0] sm:$0xff]  ;;  %v4428_v11 = vsub.f32 %v154_v22, %v4405_v49 }
 0x12e   :  { %1872 = vmatpush.msrb.mxu1 %v4079_v13  ;;  %1753 = vmatmul.f32.vlgmr.msra.gmra.mxu2 %v4319_v5  ;;  %v5411_v13 = vand.u32 4294901760, %v4357_v53  ;;  %v5293_v5 = vand.u32 4294901760, %v4385_v35  ;;  %v1965_v46 = vand.u32 4294901760, %v1964_v43  ;;  %v1999_v22 = vand.u32 4294901760, %v4415_v25 }
 0x12f   :  { %1954 = vmatpush.msrb.mxu3 %v1953_v31  ;;  %1907 = vmatpush.msrb.mxu2 %v4311_v63  ;;  %v152_v31 = vld [vmem:[#allocation2 + $0x298] sm:$0xff] }
 0x130   :  { %1592 = vmatpush.msra.mxu0 %v4241_v16  ;;  %v1970_v50 = vsub.f32 %v4357_v53, %v5411_v13  ;;  %1874 = vmatpush.msrb.mxu1 %v4094_v17  ;;  %v1976_v13 = vsub.f32 %v4368_v20, %v5413_v60  ;;  %v4417_v53 = vand.u32 4294901760, %v153_v26  ;;  %v5414_v17 = vand.u32 4294901760, %v4376_v2 }
 0x131   :  { %1598 = vmatmul.f32.vlgmr.msra.gmra.mxu0 %v1597_v32  ;;  %1792 = vmatmul.f32.vlgmr.msra.gmra.mxu3 %v1595_v34  ;;  %v151_v32 = vld [vmem:[#allocation2 + $0x290] sm:$0xff]  ;;  %v1988_v59 = vsub.f32 %v4385_v35, %v5293_v5 }
 0x132   :  { %1799 = vmatpush.msrb.mxu0 %v5412_v9  ;;  %1909 = vmatpush.msrb.mxu2 %v4323_v56  ;;  %v1982_v34 = vsub.f32 %v4376_v2, %v5414_v17  ;;  %v1971_v43 = vand.u32 4294901760, %v1970_v50  ;;  %v4430_v9 = vand.u32 4294901760, %v152_v31  ;;  %v1977_v50 = vand.u32 4294901760, %v1976_v13  ;;  %v149_v2 = vld [vmem:[#allocation2 + $0x280] sm:$0xff] }
 0x133   :  { %1960 = vmatpush.msrb.mxu3 %v1959_v57  ;;  %1876 = vmatpush.msrb.mxu1 %v4108_v27  ;;  %v150_v27 = vld [vmem:[#allocation2 + $0x288] sm:$0xff]  ;;  %v4443_v57 = vsub.f32 %v153_v26, %v4417_v53  ;;  %v4445_v17 = vand.u32 4294901760, %v151_v32  ;;  %v2005_v13 = vand.u32 4294901760, %v4428_v11 }
 0x134   :  { %1803 = vmatpush.msrb.mxu0 %v5415_v19  ;;  %2951 = vmatmul.msk.f32.vlgmr.msra.gmra.mxu1 %vm54_vm4, %v5373_v40  ;;  %v5416_v19 = vand.u32 4294901760, %v4086_v24  ;;  %v1983_v60 = vand.u32 4294901760, %v1982_v34  ;;  %v4456_v26 = vsub.f32 %v152_v31, %v4430_v9  ;;  %v4458_v5 = vand.u32 4294901760, %v150_v27 }
 0x135   :  { %1911 = vmatpush.msrb.mxu2 %v4332_v52  ;;  %1966 = vmatpush.msrb.mxu3 %v1965_v46  ;;  %v5418_v24 = vand.u32 4294901760, %v4099_v61  ;;  %v1989_v34 = vand.u32 4294901760, %v1988_v59  ;;  %v4469_v31 = vsub.f32 %v151_v32, %v4445_v17  ;;  %v4476_v61 = vld [vmem:[%s5198_s1 + $0x8] sm:$0xff]  ;;  %v2006_v59 = vsub.f32 %v4428_v11, %v2005_v13 }
 0x136   :  { %1878 = vmatpush.msrb.mxu1 %v4112_v3  ;;  %1807 = vmatpush.msrb.mxu0 %v5416_v19  ;;  %v5417_v3 = vand.u32 4294901760, %v4403_v21  ;;  %v4471_v19 = vand.u32 4294901760, %v149_v2  ;;  %vm55_vm5 = vcmp.eq.s32.totalorder %v4476_v61, %v4278_v36  ;;  %v166_v36 = vld [vmem:[#allocation2 + $0x308] sm:$0xff] }
 0x137   :  { %1913 = vmatpush.msrb.mxu2 %v4344_v14  ;;  %1972 = vmatpush.msrb.mxu3 %v1971_v43  ;;  %v2011_v43 = vand.u32 4294901760, %v4443_v57 }
 0x138   :  { %1880 = vmatpush.msrb.mxu1 %v4126_v51  ;;  %v1994_v46 = vsub.f32 %v4403_v21, %v5417_v3  ;;  %1811 = vmatpush.msrb.mxu0 %v5418_v24  ;;  %v2000_v51 = vsub.f32 %v4415_v25, %v1999_v22  ;;  %v4489_v3 = vsub.f32 %v150_v27, %v4458_v5  ;;  %v5420_v24 = vand.u32 4294901760, %v4135_v6 }
 0x139   :  { %1915 = vmatpush.msrb.mxu2 %v4352_v12  ;;  %1978 = vmatpush.msrb.mxu3 %v1977_v50  ;;  %v2017_v50 = vand.u32 4294901760, %v4456_v26  ;;  %v2936_v6 = vsel %vm55_vm5, 1.0, %v5380_v58  ;;  %v5421_v27 = vand.u32 4294901760, %v4140_v23 }
 0x13a   :  { %1882 = vmatpush.msrb.mxu1 %v4146_v45  ;;  %v5419_v45 = vand.u32 4294901760, %v4121_v15  ;;  %v1995_v32 = vand.u32 4294901760, %v1994_v46  ;;  %v2001_v15 = vand.u32 4294901760, %v2000_v51  ;;  %v4500_v46 = vsub.f32 %v149_v2, %v4471_v19 }
 0x13b   :  { %1917 = vmatpush.msrb.mxu2 %v4362_v8  ;;  %1984 = vmatpush.msrb.mxu3 %v1983_v60  ;;  %v2023_v60 = vand.u32 4294901760, %v4469_v31  ;;  %v2029_v2 = vand.u32 4294901760, %v4489_v3  ;;  %v5422_v51 = vand.u32 4294901760, %v4155_v33 }
 0x13c   :  { %1815 = vmatpush.msrb.mxu0 %v5419_v45  ;;  %1884 = vmatpush.msrb.mxu1 %v4159_v4  ;;  %v2012_v4 = vsub.f32 %v4443_v57, %v2011_v43  ;;  %v4517_v45 = vsub.f32 %v2936_v6, %v2936_v6  ;;  %v5426_v6 = vand.u32 4294901760, %v4213_v18  ;;  %v5428_v18 = vand.u32 4294901760, %v4299_v48 }
 0x13d   :  { %1919 = vmatpush.msrb.mxu2 %v4381_v0  ;;  %1990 = vmatpush.msrb.mxu3 %v1989_v34  ;;  %v2018_v34 = vsub.f32 %v4456_v26, %v2017_v50 }
 0x13e   :  { %1819 = vmatpush.msrb.mxu0 %v5420_v24  ;;  %1886 = vmatpush.msrb.mxu1 %v4175_v62  ;;  %v2007_v62 = vand.u32 4294901760, %v2006_v59  ;;  %v2013_v23 = vand.u32 4294901760, %v2012_v4  ;;  %v5423_v59 = vand.u32 4294901760, %v4173_v38  ;;  %v5424_v24 = vand.u32 4294901760, %v4185_v37 }
 0x13f   :  { %1921 = vmatpush.msrb.mxu2 %v4393_v39  ;;  %1996 = vmatpush.msrb.mxu3 %v1995_v32  ;;  %v2035_v32 = vand.u32 4294901760, %v4500_v46  ;;  %v2019_v33 = vand.u32 4294901760, %v2018_v34  ;;  %v5425_v4 = vand.u32 4294901760, %v4201_v30  ;;  %v5431_v34 = vand.u32 4294901760, %v4251_v29  ;;  %v5436_v29 = vld [vmem:[#allocation7_spill] sm:$0xff] }
 0x140   :  { %1823 = vmatpush.msrb.mxu0 %v5421_v27  ;;  %1888 = vmatpush.msrb.mxu1 %v4187_v54  ;;  %v2024_v54 = vsub.f32 %v4469_v31, %v2023_v60  ;;  %v5429_v27 = vand.u32 4294901760, %v4239_v1  ;;  %v5432_v1 = vld [vmem:[#allocation6_spill] sm:$0xff] }
 0x141   :  { %1923 = vmatpush.msrb.mxu2 %v4405_v49  ;;  %2002 = vmatpush.msrb.mxu3 %v2001_v15  ;;  %v2036_v15 = vsub.f32 %v4500_v46, %v2035_v32 }
 0x142   :  { %1827 = vmatpush.msrb.mxu0 %v5422_v51  ;;  %1890 = vmatpush.msrb.mxu1 %v4203_v44  ;;  %v2030_v44 = vsub.f32 %v4489_v3, %v2029_v2  ;;  %v2025_v38 = vand.u32 4294901760, %v2024_v54  ;;  %v5433_v51 = vand.u32 4294901760, %v5432_v1 }
 0x143   :  { %1925 = vmatpush.msrb.mxu2 %v4417_v53  ;;  %2008 = vmatpush.msrb.mxu3 %v2007_v62 }
 0x144   :  { %1831 = vmatpush.msrb.mxu0 %v5423_v59  ;;  %1892 = vmatpush.msrb.mxu1 %v4215_v42  ;;  %v1936_v42 = vand.u32 4294901760, %v4517_v45  ;;  %v2031_v37 = vand.u32 4294901760, %v2030_v44  ;;  %v5438_v59 = vld [vmem:[#allocation8_spill] sm:$0xff]  ;;  %v179_v44 = vld [vmem:[#allocation2 + $0x370] sm:$0xff] }
 0x145   :  { %1927 = vmatpush.msrb.mxu2 %v4430_v9  ;;  %2014 = vmatpush.msrb.mxu3 %v2013_v23  ;;  %v5434_v23 = vld [vmem:[#allocation5_spill] sm:$0xff] }
 0x146   :  { %1835 = vmatpush.msrb.mxu0 %v5424_v24  ;;  %1894 = vmatpush.msrb.mxu1 %v4229_v10  ;;  %v2037_v10 = vand.u32 4294901760, %v2036_v15  ;;  %v1937_v30 = vsub.f32 %v4517_v45, %v1936_v42  ;;  %v5435_v54 = vand.u32 4294901760, %v5434_v23  ;;  %v5443_v15 = vand.u32 4294901760, %v4385_v35 }
 0x147   :  { %1929 = vmatpush.msrb.mxu2 %v4445_v17  ;;  %2020 = vmatpush.msrb.mxu3 %v2019_v33  ;;  %v5439_v33 = vand.u32 4294901760, %v5438_v59 }
 0x148   :  { %1839 = vmatpush.msrb.mxu0 %v5425_v4  ;;  %1896 = vmatpush.msrb.mxu1 %v4241_v16  ;;  %v5427_v16 = vand.u32 4294901760, %v4227_v7  ;;  %v1938_v62 = vand.u32 4294901760, %v1937_v30  ;;  %v5430_v7 = vand.u32 4294901760, %v4314_v55 }
 0x149   :  { %2953 = vmatmul.msk.f32.vlgmr.msrb.gmra.mxu1 %vm54_vm4, %v5373_v40  ;;  %1931 = vmatpush.msrb.mxu2 %v4458_v5 }
 0x14a   :  { %1843 = vmatpush.msrb.mxu0 %v5426_v6  ;;  %2026 = vmatpush.msrb.mxu3 %v2025_v38 }
 0x14b   :  { %2099 = vmatpush.msra.mxu1 %v4272_v47  ;;  %1933 = vmatpush.msrb.mxu2 %v4471_v19 }
 0x14c   :  { %1847 = vmatpush.msrb.mxu0 %v5427_v16  ;;  %2032 = vmatpush.msrb.mxu3 %v2031_v37  ;;  %v177_v37 = vld [vmem:[#allocation2 + $0x360] sm:$0xff]  ;;  %v175_v16 = vld [vmem:[#allocation2 + $0x350] sm:$0xff] }
 0x14d   :  { %2101 = vmatpush.msra.mxu1 %v4290_v41  ;;  %2140 = vmatpush.msra.mxu2 %v5428_v18  ;;  %v4625_v30 = vand.u32 4294901760, %v177_v37  ;;  %v174_v18 = vld [vmem:[#allocation2 + $0x348] sm:$0xff] }
 0x14e   :  { %1851 = vmatpush.msrb.mxu0 %v5429_v27  ;;  %2038 = vmatpush.msrb.mxu3 %v2037_v10  ;;  %v176_v10 = vld [vmem:[#allocation2 + $0x358] sm:$0xff] }
 0x14f   :  { %2103 = vmatpush.msra.mxu1 %v4311_v63  ;;  %2954 = vmatmul.msk.f32.vlgmr.msrb.gmra.mxu3 %vm55_vm5, %v5373_v40  ;;  %v4645_v27 = vsub.f32 %v177_v37, %v4625_v30 }
 0x150   :  { %2144 = vmatpush.msra.mxu2 %v5430_v7  ;;  %2207 = vmatpush.msra.mxu3 %v4272_v47  ;;  %v5437_v47 = vand.u32 4294901760, %v5436_v29 }
 0x151   :  { %1855 = vmatpush.msrb.mxu0 %v5431_v34  ;;  %2105 = vmatpush.msra.mxu1 %v4323_v56  ;;  %v172_v34 = vld [vmem:[#allocation2 + $0x338] sm:$0xff] }
 0x152   :  { %1939 = vmatmul.f32.vlgmr.msrb.gmra.mxu2 %v1938_v62  ;;  %2209 = vmatpush.msra.mxu3 %v4290_v41  ;;  %v180_v41 = vld [vmem:[#allocation2 + $0x378] sm:$0xff]  ;;  %v173_v62 = vld [vmem:[#allocation2 + $0x340] sm:$0xff] }
 0x153   :  { %2148 = vmatpush.msra.mxu2 %v5433_v51  ;;  %1859 = vmatpush.msrb.mxu0 %v5435_v54  ;;  %v4596_v24 = vand.u32 4294901760, %v180_v41  ;;  %v4689_v54 = vand.u32 4294901760, %v172_v34 }
 0x154   :  { %2107 = vmatpush.msra.mxu1 %v4332_v52  ;;  %2952 = vmatmul.msk.f32.vlgmr.msrb.gmra.mxu0 %vm54_vm4, %v5373_v40 }
 0x155   :  { %2046 = vmatpush.msra.mxu0 %v4299_v48  ;;  %2152 = vmatpush.msra.mxu2 %v5437_v47  ;;  %v5440_v48 = vand.u32 4294901760, %v4368_v20 }
 0x156   :  { %2211 = vmatpush.msra.mxu3 %v4311_v63  ;;  %2109 = vmatpush.msra.mxu1 %v4344_v14  ;;  %v178_v63 = vld [vmem:[#allocation2 + $0x368] sm:$0xff] }
 0x157   :  { %2049 = vmatpush.msra.mxu0 %v4314_v55  ;;  %2156 = vmatpush.msra.mxu2 %v5439_v33  ;;  %v5441_v55 = vld [vmem:[#allocation9_spill] sm:$0xff]  ;;  %v4613_v4 = vand.u32 4294901760, %v178_v63 }
 0x158   :  { %2213 = vmatpush.msra.mxu3 %v4323_v56  ;;  %2111 = vmatpush.msra.mxu1 %v4352_v12  ;;  %v5442_v38 = vand.u32 4294901760, %v5441_v55  ;;  %v4603_v56 = vand.u32 4294901760, %v179_v44 }
 0x159   :  { %2052 = vmatpush.msra.mxu0 %v5432_v1  ;;  %2160 = vmatpush.msra.mxu2 %v5440_v48 }
 0x15a   :  { %2215 = vmatpush.msra.mxu3 %v4332_v52  ;;  %2113 = vmatpush.msra.mxu1 %v4362_v8  ;;  %v4611_v52 = vsub.f32 %v180_v41, %v4596_v24  ;;  %v4621_v6 = vsub.f32 %v179_v44, %v4603_v56 }
 0x15b   :  { %2055 = vmatpush.msra.mxu0 %v5436_v29  ;;  %2164 = vmatpush.msra.mxu2 %v5442_v38  ;;  %v170_v29 = vld [vmem:[#allocation2 + $0x328] sm:$0xff]  ;;  %v167_v38 = vld [vmem:[#allocation2 + $0x310] sm:$0xff] }
 0x15c   :  { %2217 = vmatpush.msra.mxu3 %v4344_v14  ;;  %2115 = vmatpush.msra.mxu1 %v4381_v0  ;;  %v5444_v14 = vand.u32 4294901760, %v4403_v21  ;;  %v4717_v33 = vand.u32 4294901760, %v170_v29 }
 0x15d   :  { %2058 = vmatpush.msra.mxu0 %v5438_v59  ;;  %2168 = vmatpush.msra.mxu2 %v5443_v15  ;;  %v169_v59 = vld [vmem:[#allocation2 + $0x320] sm:$0xff] }
 0x15e   :  { %2219 = vmatpush.msra.mxu3 %v4352_v12  ;;  %2117 = vmatpush.msra.mxu1 %v4393_v39  ;;  %v5311_v12 = vand.u32 4294901760, %v4611_v52  ;;  %v4745_v37 = vsub.f32 %v170_v29, %v4717_v33 }
 0x15f   :  { %2061 = vmatpush.msra.mxu0 %v4368_v20  ;;  %2172 = vmatpush.msra.mxu2 %v5444_v14  ;;  %v4632_v20 = vsub.f32 %v178_v63, %v4613_v4  ;;  %v4732_v63 = vand.u32 4294901760, %v169_v59 }
 0x160   :  { %2221 = vmatpush.msra.mxu3 %v4362_v8  ;;  %2119 = vmatpush.msra.mxu1 %v4405_v49  ;;  %v4636_v8 = vand.u32 4294901760, %v176_v10 }
 0x161   :  { %2064 = vmatpush.msra.mxu0 %v5441_v55  ;;  %2176 = vmatpush.msra.mxu2 %v1999_v22  ;;  %v5310_v22 = vand.u32 4294901760, %v4621_v6 }
 0x162   :  { %2223 = vmatpush.msra.mxu3 %v4381_v0  ;;  %2121 = vmatpush.msra.mxu1 %v4417_v53  ;;  %v4647_v0 = vand.u32 4294901760, %v175_v16  ;;  %v4661_v7 = vsub.f32 %v176_v10, %v4636_v8 }
 0x163   :  { %2067 = vmatpush.msra.mxu0 %v4385_v35  ;;  %2180 = vmatpush.msra.mxu2 %v2005_v13  ;;  %v2287_v35 = vsub.f32 %v4611_v52, %v5311_v12  ;;  %v5308_v13 = vand.u32 4294901760, %v4632_v20 }
 0x164   :  { %2225 = vmatpush.msra.mxu3 %v4393_v39  ;;  %2123 = vmatpush.msra.mxu1 %v4430_v9  ;;  %v4656_v39 = vand.u32 4294901760, %v174_v18  ;;  %v4675_v1 = vsub.f32 %v175_v16, %v4647_v0  ;;  %v5305_v23 = vand.u32 4294901760, %v4661_v7 }
 0x165   :  { %2070 = vmatpush.msra.mxu0 %v4403_v21  ;;  %2184 = vmatpush.msra.mxu2 %v2011_v43  ;;  %v2293_v21 = vsub.f32 %v4621_v6, %v5310_v22  ;;  %v4669_v43 = vand.u32 4294901760, %v173_v62 }
 0x166   :  { %2227 = vmatpush.msra.mxu3 %v4405_v49  ;;  %2125 = vmatpush.msra.mxu1 %v4445_v17  ;;  %v5307_v49 = vand.u32 4294901760, %v4645_v27  ;;  %v4684_v51 = vsub.f32 %v174_v18, %v4656_v39  ;;  %v5304_v47 = vand.u32 4294901760, %v4675_v1  ;;  %v4757_v18 = vsub.f32 %v169_v59, %v4732_v63 }
 0x167   :  { %2073 = vmatpush.msra.mxu0 %v4415_v25  ;;  %2188 = vmatpush.msra.mxu2 %v2017_v50  ;;  %v2288_v25 = vand.u32 4294901760, %v2287_v35  ;;  %v2299_v50 = vsub.f32 %v4632_v20, %v5308_v13  ;;  %v165_v35 = vld [vmem:[#allocation2 + $0x300] sm:$0xff] }
 0x168   :  { %2229 = vmatpush.msra.mxu3 %v4417_v53  ;;  %2127 = vmatpush.msra.mxu1 %v4458_v5  ;;  %v171_v53 = vld [vmem:[#allocation2 + $0x330] sm:$0xff]  ;;  %v5303_v41 = vand.u32 4294901760, %v4684_v51  ;;  %v2317_v44 = vsub.f32 %v4675_v1, %v5304_v47  ;;  %v4783_v29 = vand.u32 4294901760, %v165_v35 }
 0x169   :  { %2076 = vmatpush.msra.mxu0 %v4428_v11  ;;  %2192 = vmatpush.msra.mxu2 %v2023_v60  ;;  %v2294_v11 = vand.u32 4294901760, %v2293_v21  ;;  %v4695_v60 = vsub.f32 %v173_v62, %v4669_v43  ;;  %v4759_v62 = vand.u32 4294901760, %v167_v38 }
 0x16a   :  { %2231 = vmatpush.msra.mxu3 %v4430_v9  ;;  %2129 = vmatpush.msra.mxu1 %v4471_v19  ;;  %v2305_v9 = vsub.f32 %v4645_v27, %v5307_v49  ;;  %v2323_v55 = vsub.f32 %v4684_v51, %v5303_v41  ;;  %v2318_v10 = vand.u32 4294901760, %v2317_v44  ;;  %v189_v41 = vld [vmem:[#allocation2 + $0x3c0] sm:$0xff] }
 0x16b   :  { %2079 = vmatpush.msra.mxu0 %v4443_v57  ;;  %2133 = vmatmul.f32.vlgmr.msra.gmra.mxu1 %v1936_v42  ;;  %v4704_v57 = vand.u32 4294901760, %v171_v53  ;;  %v2300_v42 = vand.u32 4294901760, %v2299_v50  ;;  %v4771_v50 = vand.u32 4294901760, %v166_v36  ;;  %v4899_v13 = vand.u32 4294901760, %v189_v41 }
 0x16c   :  { %2196 = vmatpush.msra.mxu2 %v2029_v2  ;;  %2233 = vmatpush.msra.mxu3 %v4445_v17  ;;  %v2311_v17 = vsub.f32 %v4661_v7, %v5305_v23  ;;  %v4715_v2 = vsub.f32 %v172_v34, %v4689_v54  ;;  %v5299_v34 = vand.u32 4294901760, %v4745_v37 }
 0x16d   :  { %2289 = vmatpush.msrb.mxu1 %v2288_v25  ;;  %2082 = vmatpush.msra.mxu0 %v4456_v26  ;;  %v5302_v26 = vand.u32 4294901760, %v4695_v60  ;;  %v4730_v48 = vsub.f32 %v171_v53, %v4704_v57  ;;  %v5297_v53 = vand.u32 4294901760, %v4757_v18  ;;  %v4922_v22 = vsub.f32 %v189_v41, %v4899_v13 }
 0x16e   :  { %2200 = vmatpush.msra.mxu2 %v2035_v32  ;;  %2235 = vmatpush.msra.mxu3 %v4458_v5  ;;  %v168_v32 = vld [vmem:[#allocation2 + $0x318] sm:$0xff]  ;;  %v2306_v5 = vand.u32 4294901760, %v2305_v9  ;;  %v5301_v15 = vand.u32 4294901760, %v4715_v2 }
 0x16f   :  { %2295 = vmatpush.msrb.mxu1 %v2294_v11  ;;  %2955 = vmatmul.msk.f32.vlgmr.msra.gmra.mxu2 %vm55_vm5, %v5373_v40  ;;  %v2329_v14 = vsub.f32 %v4695_v60, %v5302_v26  ;;  %v5300_v16 = vand.u32 4294901760, %v4730_v48  ;;  %v4781_v11 = vsub.f32 %v167_v38, %v4759_v62  ;;  %v196_v38 = vld [vmem:[#allocation2 + $0x3f8] sm:$0xff]  ;;  %v190_v26 = vld [vmem:[#allocation2 + $0x3c8] sm:$0xff] }
 0x170   :  { %2387 = vmatpush.msrb.mxu2 %v4611_v52  ;;  %2085 = vmatpush.msra.mxu0 %v4469_v31  ;;  %v2312_v31 = vand.u32 4294901760, %v2311_v17  ;;  %v2335_v21 = vsub.f32 %v4715_v2, %v5301_v15  ;;  %v4793_v17 = vsub.f32 %v166_v36, %v4771_v50 }
 0x171   :  { %2237 = vmatpush.msra.mxu3 %v4471_v19  ;;  %2301 = vmatpush.msrb.mxu1 %v2300_v42  ;;  %v4747_v19 = vand.u32 4294901760, %v168_v32  ;;  %v2347_v42 = vsub.f32 %v4745_v37, %v5299_v34  ;;  %v5294_v44 = vand.u32 4294901760, %v4781_v11  ;;  %v192_v34 = vld [vmem:[#allocation2 + $0x3d8] sm:$0xff] }
 0x172   :  { %2956 = vmatmul.msk.f32.vlgmr.msra.gmra.mxu3 %vm55_vm5, %v5373_v40  ;;  %2390 = vmatpush.msrb.mxu2 %v4621_v6  ;;  %v2336_v9 = vand.u32 4294901760, %v2335_v21  ;;  %5445 = vst [vmem:[#allocation10_spill] sm:$0xff] %v4793_v17  ;;  %v5295_v36 = vand.u32 4294901760, %v4793_v17  ;;  %v4869_v15 = vand.u32 4294901760, %v192_v34 }
 0x173   :  { %2440 = vmatpush.msrb.mxu3 %v4596_v24  ;;  %2088 = vmatpush.msra.mxu0 %v4489_v3  ;;  %v2324_v3 = vand.u32 4294901760, %v2323_v55  ;;  %v4769_v25 = vsub.f32 %v168_v32, %v4747_v19  ;;  %v4803_v55 = vsub.f32 %v165_v35, %v4783_v29  ;;  %v2365_v21 = vsub.f32 %v4781_v11, %v5294_v44 }
 0x174   :  { %2307 = vmatpush.msrb.mxu1 %v2306_v5  ;;  %2393 = vmatpush.msrb.mxu2 %v4632_v20  ;;  %v2353_v5 = vsub.f32 %v4757_v18, %v5297_v53 }
 0x175   :  { %2442 = vmatpush.msrb.mxu3 %v4603_v56  ;;  %2091 = vmatpush.msra.mxu0 %v4500_v46  ;;  %v2330_v46 = vand.u32 4294901760, %v2329_v14  ;;  %v5296_v59 = vand.u32 4294901760, %v4769_v25  ;;  %5446 = vst [vmem:[#allocation6_spill] sm:$0xff] %v4803_v55 }
 0x176   :  { %2313 = vmatpush.msrb.mxu1 %v2312_v31  ;;  %2094 = vmatmul.f32.vlgmr.msra.gmra.mxu0 %v4517_v45  ;;  %v2341_v45 = vsub.f32 %v4730_v48, %v5300_v16  ;;  %v2348_v31 = vand.u32 4294901760, %v2347_v42  ;;  %v2354_v35 = vand.u32 4294901760, %v2353_v5  ;;  %v194_v5 = vld [vmem:[#allocation2 + $0x3e8] sm:$0xff] }
 0x177   :  { %2244 = vmatpush.msrb.mxu0 %v4596_v24  ;;  %2396 = vmatpush.msrb.mxu2 %v4645_v27  ;;  %v2359_v14 = vsub.f32 %v4769_v25, %v5296_v59  ;;  %v4848_v59 = vand.u32 4294901760, %v194_v5 }
 0x178   :  { %2444 = vmatpush.msrb.mxu3 %v4613_v4  ;;  %2319 = vmatpush.msrb.mxu1 %v2318_v10  ;;  %v2342_v32 = vand.u32 4294901760, %v2341_v45  ;;  %v195_v10 = vld [vmem:[#allocation2 + $0x3f0] sm:$0xff] }
 0x179   :  { %2246 = vmatpush.msrb.mxu0 %v4603_v56  ;;  %2399 = vmatpush.msrb.mxu2 %v4661_v7  ;;  %v2360_v42 = vand.u32 4294901760, %v2359_v14 }
 0x17a   :  { %2446 = vmatpush.msrb.mxu3 %v4625_v30  ;;  %2325 = vmatpush.msrb.mxu1 %v2324_v3  ;;  %v4814_v3 = vand.u32 4294901760, %v196_v38 }
 0x17b   :  { %2248 = vmatpush.msrb.mxu0 %v4613_v4  ;;  %2402 = vmatpush.msrb.mxu2 %v4675_v1 }
 0x17c   :  { %2448 = vmatpush.msrb.mxu3 %v4636_v8  ;;  %2331 = vmatpush.msrb.mxu1 %v2330_v46  ;;  %v5298_v46 = vand.u32 4294901760, %v4803_v55  ;;  %v4836_v44 = vsub.f32 %v196_v38, %v4814_v3 }
 0x17d   :  { %2250 = vmatpush.msrb.mxu0 %v4625_v30  ;;  %2405 = vmatpush.msrb.mxu2 %v4684_v51 }
 0x17e   :  { %2450 = vmatpush.msrb.mxu3 %v4647_v0  ;;  %2337 = vmatpush.msrb.mxu1 %v2336_v9  ;;  %v4825_v9 = vand.u32 4294901760, %v195_v10 }
 0x17f   :  { %2252 = vmatpush.msrb.mxu0 %v4636_v8  ;;  %2408 = vmatpush.msrb.mxu2 %v4695_v60 }
 0x180   :  { %2452 = vmatpush.msrb.mxu3 %v4656_v39  ;;  %2343 = vmatpush.msrb.mxu1 %v2342_v32  ;;  %v4823_v45 = vpop.permute.xlu1 %61  ;;  %v2371_v32 = vsub.f32 %v4793_v17, %v5295_v36  ;;  %v2377_v36 = vsub.f32 %v4803_v55, %v5298_v46  ;;  %v4851_v38 = vsub.f32 %v195_v10, %v4825_v9  ;;  %v5306_v46 = vand.u32 4294901760, %v4836_v44 }
 0x181   :  { %2254 = vmatpush.msrb.mxu0 %v4647_v0  ;;  %2411 = vmatpush.msrb.mxu2 %v4715_v2  ;;  %vm63_vm6 = vcmp.eq.s32.totalorder %v4286_v28, %v4823_v45  ;;  %vm64_vm7 = vcmp.eq.s32.totalorder %v4476_v61, %v4823_v45  ;;  %v235_v28 = vpop.f32.mrf.mxu0 }
 0x182   :  { %2454 = vmatpush.msrb.mxu3 %v4669_v43  ;;  %2349 = vmatpush.msrb.mxu1 %v2348_v31  ;;  %v2366_v31 = vand.u32 4294901760, %v2365_v21  ;;  %v2937_v14 = vsel %vm63_vm6, 1.0, %v5380_v58  ;;  %v2372_v21 = vand.u32 4294901760, %v2371_v32  ;;  %v2378_v16 = vand.u32 4294901760, %v2377_v36 }
 0x183   :  { %2256 = vmatpush.msrb.mxu0 %v4656_v39  ;;  %2414 = vmatpush.msrb.mxu2 %v4730_v48  ;;  %v4856_v53 = vsub.f32 %v2937_v14, %v2937_v14  ;;  %v4866_v32 = vsub.f32 %v194_v5, %v4848_v59  ;;  %v191_v14 = vld [vmem:[#allocation2 + $0x3d0] sm:$0xff] }
 0x184   :  { %2456 = vmatpush.msrb.mxu3 %v4689_v54  ;;  %2355 = vmatpush.msrb.mxu1 %v2354_v35  ;;  %v193_v35 = vld [vmem:[#allocation2 + $0x3e0] sm:$0xff] }
 0x185   :  { %2258 = vmatpush.msrb.mxu0 %v4669_v43  ;;  %2417 = vmatpush.msrb.mxu2 %v4745_v37  ;;  %v4860_v10 = vand.u32 4294901760, %v193_v35  ;;  %5447 = vst [vmem:[#allocation5_spill] sm:$0xff] %v4866_v32  ;;  %v2277_v36 = vand.u32 4294901760, %v4856_v53  ;;  %v5313_v23 = vand.u32 4294901760, %v4866_v32 }
 0x186   :  { %2458 = vmatpush.msrb.mxu3 %v4704_v57  ;;  %2361 = vmatpush.msrb.mxu1 %v2360_v42  ;;  %v5309_v42 = vand.u32 4294901760, %v4851_v38 }
 0x187   :  { %2260 = vmatpush.msrb.mxu0 %v4689_v54  ;;  %2420 = vmatpush.msrb.mxu2 %v4757_v18  ;;  %v4879_v5 = vsub.f32 %v193_v35, %v4860_v10  ;;  %v2278_v49 = vsub.f32 %v4856_v53, %v2277_v36 }
 0x188   :  { %2460 = vmatpush.msrb.mxu3 %v4717_v33  ;;  %2367 = vmatpush.msrb.mxu1 %v2366_v31  ;;  %v2628_v31 = vsub.f32 %v4836_v44, %v5306_v46  ;;  %v2634_v47 = vsub.f32 %v4851_v38, %v5309_v42  ;;  %v4889_v46 = vand.u32 4294901760, %v190_v26  ;;  %v188_v42 = vld [vmem:[#allocation2 + $0x3b8] sm:$0xff] }
 0x189   :  { %2262 = vmatpush.msrb.mxu0 %v4704_v57  ;;  %2423 = vmatpush.msrb.mxu2 %v4769_v25  ;;  %5448 = vst [vmem:[#allocation7_spill] sm:$0xff] %v4879_v5 }
 0x18a   :  { %2462 = vmatpush.msrb.mxu3 %v4732_v63  ;;  %2373 = vmatpush.msrb.mxu1 %v2372_v21  ;;  %v4881_v21 = vand.u32 4294901760, %v191_v14  ;;  %v2629_v35 = vand.u32 4294901760, %v2628_v31  ;;  %v2640_v31 = vsub.f32 %v4866_v32, %v5313_v23  ;;  %v4913_v12 = vsub.f32 %v190_v26, %v4889_v46  ;;  %v186_v23 = vld [vmem:[#allocation2 + $0x3a8] sm:$0xff] }
 0x18b   :  { %2264 = vmatpush.msrb.mxu0 %v4717_v33  ;;  %2426 = vmatpush.msrb.mxu2 %v4781_v11  ;;  %v5451_v26 = vand.u32 4294901760, %v4879_v5 }
 0x18c   :  { %2464 = vmatpush.msrb.mxu3 %v4747_v19  ;;  %2379 = vmatpush.msrb.mxu1 %v2378_v16  ;;  %v4894_v16 = vsub.f32 %v192_v34, %v4869_v15  ;;  %v2635_v34 = vand.u32 4294901760, %v2634_v47  ;;  %5450 = vst [vmem:[#allocation9_spill] sm:$0xff] %v4913_v12  ;;  %v2279_v47 = vand.u32 4294901760, %v2278_v49  ;;  %v2641_v49 = vand.u32 4294901760, %v2640_v31 }
 0x18d   :  { %2266 = vmatpush.msrb.mxu0 %v4732_v63  ;;  %2429 = vmatpush.msrb.mxu2 %v4793_v17  ;;  %v5453_v31 = vand.u32 4294901760, %v4611_v52  ;;  %v5456_v52 = vand.u32 4294901760, %v4621_v6 }
 0x18e   :  { %2466 = vmatpush.msrb.mxu3 %v4759_v62  ;;  %2548 = vmatpush.msra.mxu1 %v4596_v24  ;;  %5449 = vst [vmem:[#allocation8_spill] sm:$0xff] %v4894_v16  ;;  %v4905_v24 = vsub.f32 %v191_v14, %v4881_v21  ;;  %v4918_v14 = vand.u32 4294901760, %v188_v42 }
 0x18f   :  { %2268 = vmatpush.msrb.mxu0 %v4747_v19  ;;  %2432 = vmatpush.msrb.mxu2 %v4803_v55  ;;  %v187_v55 = vld [vmem:[#allocation2 + $0x3b0] sm:$0xff] }
 0x190   :  { %2468 = vmatpush.msrb.mxu3 %v4771_v50  ;;  %2550 = vmatpush.msra.mxu1 %v4603_v56  ;;  %v4930_v32 = vand.u32 4294901760, %v187_v55  ;;  %v4942_v56 = vand.u32 4294901760, %v186_v23 }
 0x191   :  { %2585 = vmatpush.msra.mxu2 %v4814_v3  ;;  %2270 = vmatpush.msrb.mxu0 %v4759_v62 }
 0x192   :  { %2470 = vmatpush.msrb.mxu3 %v4783_v29  ;;  %2552 = vmatpush.msra.mxu1 %v4613_v4  ;;  %v2646_v4 = vsub.f32 %v4879_v5, %v5451_v26  ;;  %v4940_v26 = vsub.f32 %v188_v42, %v4918_v14  ;;  %v5454_v5 = vand.u32 4294901760, %v4905_v24  ;;  %v4952_v42 = vsub.f32 %v187_v55, %v4930_v32 }
 0x193   :  { %2587 = vmatpush.msra.mxu2 %v4825_v9  ;;  %2272 = vmatpush.msrb.mxu0 %v4771_v50  ;;  %v4965_v55 = vsub.f32 %v186_v23, %v4942_v56 }
 0x194   :  { %2630 = vmatpush.msra.mxu3 %v2629_v35  ;;  %2554 = vmatpush.msra.mxu1 %v4625_v30  ;;  %v185_v35 = vld [vmem:[#allocation2 + $0x3a0] sm:$0xff]  ;;  %v5452_v30 = vand.u32 4294901760, %v4894_v16  ;;  %v2647_v41 = vand.u32 4294901760, %v2646_v4  ;;  %v2681_v23 = vand.u32 4294901760, %v4952_v42 }
 0x195   :  { %2435 = vmatmul.f32.vlgmr.msrb.gmra.mxu2 %v4856_v53  ;;  %2274 = vmatpush.msrb.mxu0 %v4783_v29  ;;  %v5323_v53 = vand.u32 4294901760, %v4922_v22 }
 0x196   :  { %2636 = vmatpush.msra.mxu3 %v2635_v34  ;;  %2589 = vmatpush.msra.mxu2 %v4848_v59  ;;  %v2652_v17 = vsub.f32 %v4894_v16, %v5452_v30  ;;  %v184_v34 = vld [vmem:[#allocation2 + $0x398] sm:$0xff]  ;;  %v2658_v30 = vsub.f32 %v4905_v24, %v5454_v5  ;;  %v4954_v16 = vand.u32 4294901760, %v185_v35 }
 0x197   :  { %2556 = vmatpush.msra.mxu1 %v4636_v8  ;;  %2280 = vmatmul.f32.vlgmr.msrb.gmra.mxu0 %v2279_v47  ;;  %v5455_v8 = vand.u32 4294901760, %v4913_v12  ;;  %v183_v47 = vld [vmem:[#allocation2 + $0x390] sm:$0xff]  ;;  %v2670_v6 = vsub.f32 %v4922_v22, %v5323_v53 }
 0x198   :  { %2474 = vmatmul.f32.vlgmr.msrb.gmra.mxu3 %v2277_v36  ;;  %2481 = vmatpush.msra.mxu0 %v5453_v31  ;;  %v2653_v4 = vand.u32 4294901760, %v2652_v17  ;;  %v4967_v31 = vand.u32 4294901760, %v184_v34  ;;  %v2659_v17 = vand.u32 4294901760, %v2658_v30  ;;  %v2687_v30 = vand.u32 4294901760, %v4965_v55 }
 0x199   :  { %2591 = vmatpush.msra.mxu2 %v4860_v10  ;;  %2642 = vmatpush.msra.mxu3 %v2641_v49  ;;  %v2664_v36 = vsub.f32 %v4913_v12, %v5455_v8  ;;  %v4980_v49 = vsub.f32 %v185_v35, %v4954_v16  ;;  %v4982_v8 = vand.u32 4294901760, %v183_v47  ;;  %v181_v12 = vld [vmem:[#allocation2 + $0x380] sm:$0xff] }
 0x19a   :  { %2558 = vmatpush.msra.mxu1 %v4647_v0  ;;  %2485 = vmatpush.msra.mxu0 %v5456_v52  ;;  %v182_v0 = vld [vmem:[#allocation2 + $0x388] sm:$0xff]  ;;  %v5457_v52 = vand.u32 4294901760, %v4632_v20  ;;  %v4993_v35 = vsub.f32 %v184_v34, %v4967_v31  ;;  %v5459_v20 = vand.u32 4294901760, %v4645_v27  ;;  %v5460_v27 = vand.u32 4294901760, %v4661_v7 }
 0x19b   :  { %2957 = vmatmul.msk.f32.vlgmr.msrb.gmra.mxu1 %vm63_vm6, %v5373_v40  ;;  %2593 = vmatpush.msra.mxu2 %v4869_v15  ;;  %v2665_v5 = vand.u32 4294901760, %v2664_v36  ;;  %v4995_v53 = vand.u32 4294901760, %v182_v0  ;;  %v2671_v36 = vand.u32 4294901760, %v2670_v6  ;;  %v5006_v34 = vsub.f32 %v183_v47, %v4982_v8 }
 0x19c   :  { %2648 = vmatpush.msra.mxu3 %v2647_v41  ;;  %2560 = vmatpush.msra.mxu1 %v4656_v39  ;;  %v5458_v39 = vand.u32 4294901760, %v4940_v26  ;;  %v2688_v6 = vsub.f32 %v4965_v55, %v2687_v30  ;;  %v2699_v47 = vand.u32 4294901760, %v4993_v35 }
 0x19d   :  { %2489 = vmatpush.msra.mxu0 %v5457_v52  ;;  %2595 = vmatpush.msra.mxu2 %v4881_v21  ;;  %v5008_v52 = vand.u32 4294901760, %v181_v12 }
 0x19e   :  { %2654 = vmatpush.msra.mxu3 %v2653_v4  ;;  %2562 = vmatpush.msra.mxu1 %v4669_v43  ;;  %v2676_v41 = vsub.f32 %v4940_v26, %v5458_v39  ;;  %v2682_v43 = vsub.f32 %v4952_v42, %v2681_v23  ;;  %v2693_v4 = vand.u32 4294901760, %v4980_v49  ;;  %v5461_v39 = vand.u32 4294901760, %v4675_v1 }
 0x19f   :  { %2493 = vmatpush.msra.mxu0 %v5459_v20  ;;  %2597 = vmatpush.msra.mxu2 %v4889_v46  ;;  %v2938_v1 = vsel %vm64_vm7, 1.0, %v5380_v58  ;;  %v2700_v20 = vsub.f32 %v4993_v35, %v2699_v47 }
 0x1a0   :  { %2660 = vmatpush.msra.mxu3 %v2659_v17  ;;  %2564 = vmatpush.msra.mxu1 %v4689_v54  ;;  %v2677_v54 = vand.u32 4294901760, %v2676_v41  ;;  %v5021_v17 = vsub.f32 %v182_v0, %v4995_v53  ;;  %v2683_v7 = vand.u32 4294901760, %v2682_v43  ;;  %v5032_v41 = vsub.f32 %v181_v12, %v5008_v52 }
 0x1a1   :  { %2497 = vmatpush.msra.mxu0 %v5460_v27  ;;  %2599 = vmatpush.msra.mxu2 %v4899_v13  ;;  %v5462_v0 = vand.u32 4294901760, %v4684_v51  ;;  %v5049_v58 = vsub.f32 %v2938_v1, %v2938_v1  ;;  %v5464_v27 = vand.u32 4294901760, %v4715_v2 }
 0x1a2   :  { %2666 = vmatpush.msra.mxu3 %v2665_v5  ;;  %2566 = vmatpush.msra.mxu1 %v4704_v57  ;;  %v2694_v57 = vsub.f32 %v4980_v49, %v2693_v4  ;;  %v2705_v5 = vand.u32 4294901760, %v5006_v34  ;;  %v2711_v12 = vand.u32 4294901760, %v5021_v17  ;;  %v2717_v43 = vand.u32 4294901760, %v5032_v41 }
 0x1a3   :  { %2501 = vmatpush.msra.mxu0 %v5461_v39  ;;  %2601 = vmatpush.msra.mxu2 %v4918_v14  ;;  %v5466_v39 = vand.u32 4294901760, %v4745_v37 }
 0x1a4   :  { %2672 = vmatpush.msra.mxu3 %v2671_v36  ;;  %2568 = vmatpush.msra.mxu1 %v4717_v33  ;;  %v2689_v33 = vand.u32 4294901760, %v2688_v6  ;;  %v5463_v36 = vand.u32 4294901760, %v4695_v60  ;;  %v2695_v51 = vand.u32 4294901760, %v2694_v57  ;;  %v2701_v60 = vand.u32 4294901760, %v2700_v20 }
 0x1a5   :  { %2505 = vmatpush.msra.mxu0 %v5462_v0  ;;  %2603 = vmatpush.msra.mxu2 %v4930_v32  ;;  %v2618_v6 = vand.u32 4294901760, %v5049_v58  ;;  %v5470_v57 = vand.u32 4294901760, %v4781_v11  ;;  %v5472_v0 = vld [vmem:[#allocation10_spill] sm:$0xff]  ;;  %v5474_v11 = vld [vmem:[#allocation5_spill] sm:$0xff] }
 0x1a6   :  { %2678 = vmatpush.msra.mxu3 %v2677_v54  ;;  %2570 = vmatpush.msra.mxu1 %v4732_v63  ;;  %v2706_v63 = vsub.f32 %v5006_v34, %v2705_v5  ;;  %v5465_v54 = vand.u32 4294901760, %v4730_v48  ;;  %v5475_v20 = vand.u32 4294901760, %v5474_v11 }
 0x1a7   :  { %2509 = vmatpush.msra.mxu0 %v5463_v36  ;;  %2605 = vmatpush.msra.mxu2 %v4942_v56  ;;  %v2619_v37 = vsub.f32 %v5049_v58, %v2618_v6  ;;  %v5476_v36 = vld [vmem:[#allocation6_spill] sm:$0xff] }
 0x1a8   :  { %2684 = vmatpush.msra.mxu3 %v2683_v7  ;;  %2572 = vmatpush.msra.mxu1 %v4747_v19  ;;  %v2712_v19 = vsub.f32 %v5021_v17, %v2711_v12  ;;  %v2707_v2 = vand.u32 4294901760, %v2706_v63  ;;  %v5467_v7 = vand.u32 4294901760, %v4757_v18  ;;  %v5469_v18 = vand.u32 4294901760, %v4836_v44 }
 0x1a9   :  { %2513 = vmatpush.msra.mxu0 %v5464_v27  ;;  %2607 = vmatpush.msra.mxu2 %v4954_v16  ;;  %v2620_v1 = vand.u32 4294901760, %v2619_v37 }
 0x1aa   :  { %2690 = vmatpush.msra.mxu3 %v2689_v33  ;;  %2574 = vmatpush.msra.mxu1 %v4759_v62  ;;  %v2718_v62 = vsub.f32 %v5032_v41, %v2717_v43  ;;  %v2713_v48 = vand.u32 4294901760, %v2712_v19  ;;  %v5473_v33 = vand.u32 4294901760, %v5472_v0 }
 0x1ab   :  { %2517 = vmatpush.msra.mxu0 %v5465_v54  ;;  %2609 = vmatpush.msra.mxu2 %v4967_v31  ;;  %v5486_v54 = vand.u32 4294901760, %v4940_v26 }
 0x1ac   :  { %2696 = vmatpush.msra.mxu3 %v2695_v51  ;;  %2576 = vmatpush.msra.mxu1 %v4771_v50  ;;  %v2719_v50 = vand.u32 4294901760, %v2718_v62  ;;  %v5477_v51 = vand.u32 4294901760, %v5476_v36 }
 0x1ad   :  { %2521 = vmatpush.msra.mxu0 %v5466_v39  ;;  %2611 = vmatpush.msra.mxu2 %v4982_v8 }
 0x1ae   :  { %2702 = vmatpush.msra.mxu3 %v2701_v60  ;;  %2578 = vmatpush.msra.mxu1 %v4783_v29  ;;  %v5468_v29 = vand.u32 4294901760, %v4769_v25  ;;  %v5471_v25 = vand.u32 4294901760, %v4851_v38 }
 0x1af   :  { %2525 = vmatpush.msra.mxu0 %v5467_v7  ;;  %2959 = vmatmul.msk.f32.vlgmr.msra.gmra.mxu1 %vm63_vm6, %v5373_v40 }
 0x1b0   :  { %2613 = vmatpush.msra.mxu2 %v4995_v53  ;;  %2708 = vmatpush.msra.mxu3 %v2707_v2 }
 0x1b1   :  { %2781 = vmatpush.msrb.mxu1 %v4814_v3  ;;  %2529 = vmatpush.msra.mxu0 %v5468_v29 }
 0x1b2   :  { %2615 = vmatpush.msra.mxu2 %v5008_v52  ;;  %2714 = vmatpush.msra.mxu3 %v2713_v48 }
 0x1b3   :  { %2783 = vmatpush.msrb.mxu1 %v4825_v9  ;;  %2533 = vmatpush.msra.mxu0 %v5470_v57 }
 0x1b4   :  { %2822 = vmatpush.msrb.mxu2 %v5469_v18  ;;  %2720 = vmatpush.msra.mxu3 %v2719_v50 }
 0x1b5   :  { %2785 = vmatpush.msrb.mxu1 %v4848_v59  ;;  %2960 = vmatmul.msk.f32.vlgmr.msra.gmra.mxu3 %vm64_vm7, %v5373_v40 }
 0x1b6   :  { %2826 = vmatpush.msrb.mxu2 %v5471_v25  ;;  %2889 = vmatpush.msrb.mxu3 %v4814_v3  ;;  %v5478_v3 = vld [vmem:[#allocation7_spill] sm:$0xff] }
 0x1b7   :  { %2537 = vmatpush.msra.mxu0 %v5473_v33  ;;  %2787 = vmatpush.msrb.mxu1 %v4860_v10  ;;  %v5479_v63 = vand.u32 4294901760, %v5478_v3 }
 0x1b8   :  { %2621 = vmatmul.f32.vlgmr.msra.gmra.mxu2 %v2620_v1  ;;  %2891 = vmatpush.msrb.mxu3 %v4825_v9  ;;  %v5480_v9 = vld [vmem:[#allocation8_spill] sm:$0xff] }
 0x1b9   :  { %2830 = vmatpush.msrb.mxu2 %v5475_v20  ;;  %2541 = vmatpush.msra.mxu0 %v5477_v51  ;;  %v5481_v27 = vand.u32 4294901760, %v5480_v9 }
 0x1ba   :  { %2789 = vmatpush.msrb.mxu1 %v4869_v15  ;;  %2958 = vmatmul.msk.f32.vlgmr.msra.gmra.mxu0 %vm63_vm6, %v5373_v40 }
 0x1bb   :  { %2728 = vmatpush.msrb.mxu0 %v4836_v44  ;;  %2834 = vmatpush.msrb.mxu2 %v5479_v63  ;;  %v5482_v44 = vand.u32 4294901760, %v4905_v24 }
 0x1bc   :  { %2893 = vmatpush.msrb.mxu3 %v4848_v59  ;;  %2791 = vmatpush.msrb.mxu1 %v4881_v21  ;;  %v336_v59 = vpop.f32.mrf.mxu1 }
 0x1bd   :  { %2731 = vmatpush.msrb.mxu0 %v4851_v38  ;;  %2838 = vmatpush.msrb.mxu2 %v5481_v27  ;;  %v5483_v38 = vld [vmem:[#allocation9_spill] sm:$0xff]  ;;  %v337_v19 = vadd.f32 %v336_v59, %v235_v28 }
 0x1be   :  { %2895 = vmatpush.msrb.mxu3 %v4860_v10  ;;  %2793 = vmatpush.msrb.mxu1 %v4889_v46  ;;  %v5484_v60 = vand.u32 4294901760, %v5483_v38  ;;  %v5485_v10 = vand.u32 4294901760, %v4922_v22 }
 0x1bf   :  { %2734 = vmatpush.msrb.mxu0 %v5474_v11  ;;  %2842 = vmatpush.msrb.mxu2 %v5482_v44 }
 0x1c0   :  { %2897 = vmatpush.msrb.mxu3 %v4869_v15  ;;  %2795 = vmatpush.msrb.mxu1 %v4899_v13  ;;  %v390_v15 = vpop.f32.mrf.mxu2 }
 0x1c1   :  { %2737 = vmatpush.msrb.mxu0 %v5478_v3  ;;  %2846 = vmatpush.msrb.mxu2 %v5484_v60  ;;  %v391_v2 = vadd.f32 %v390_v15, %v337_v19 }
 0x1c2   :  { %2899 = vmatpush.msrb.mxu3 %v4881_v21  ;;  %2797 = vmatpush.msrb.mxu1 %v4918_v14  ;;  %v498_v21 = vpop.f32.mrf.mxu0 }
 0x1c3   :  { %2740 = vmatpush.msrb.mxu0 %v5480_v9  ;;  %2850 = vmatpush.msrb.mxu2 %v5485_v10 }
 0x1c4   :  { %2901 = vmatpush.msrb.mxu3 %v4889_v46  ;;  %2799 = vmatpush.msrb.mxu1 %v4930_v32  ;;  %v429_v46 = vpop.f32.mrf.mxu3 }
 0x1c5   :  { %2743 = vmatpush.msrb.mxu0 %v4905_v24  ;;  %2854 = vmatpush.msrb.mxu2 %v5486_v54  ;;  %v430_v24 = vadd.f32 %v429_v46, %v391_v2 }
 0x1c6   :  { %2903 = vmatpush.msrb.mxu3 %v4899_v13  ;;  %2801 = vmatpush.msrb.mxu1 %v4942_v56 }
 0x1c7   :  { %2746 = vmatpush.msrb.mxu0 %v5483_v38  ;;  %2858 = vmatpush.msrb.mxu2 %v2681_v23  ;;  %v499_v13 = vadd.f32 %v498_v21, %v430_v24 }
 0x1c8   :  { %2905 = vmatpush.msrb.mxu3 %v4918_v14  ;;  %2803 = vmatpush.msrb.mxu1 %v4954_v16 }
 0x1c9   :  { %2749 = vmatpush.msrb.mxu0 %v4922_v22  ;;  %2862 = vmatpush.msrb.mxu2 %v2687_v30  ;;  %v535_v22 = vpop.f32.mrf.mxu1 }
 0x1ca   :  { %2907 = vmatpush.msrb.mxu3 %v4930_v32  ;;  %2805 = vmatpush.msrb.mxu1 %v4967_v31  ;;  %v536_v32 = vadd.f32 %v535_v22, %v499_v13 }
 0x1cb   :  { %2752 = vmatpush.msrb.mxu0 %v4940_v26  ;;  %2866 = vmatpush.msrb.mxu2 %v2693_v4 }
 0x1cc   :  { %2909 = vmatpush.msrb.mxu3 %v4942_v56  ;;  %2807 = vmatpush.msrb.mxu1 %v4982_v8  ;;  %v5487_v56 = vmov 3   ;;  %v677_v26 = vpop.f32.mrf.mxu3 }
 0x1cd   :  { %2755 = vmatpush.msrb.mxu0 %v4952_v42  ;;  %2870 = vmatpush.msrb.mxu2 %v2699_v47  ;;  %v731_v42 = vpop.f32.mrf.mxu0 }
 0x1ce   :  { %2911 = vmatpush.msrb.mxu3 %v4954_v16  ;;  %2809 = vmatpush.msrb.mxu1 %v4995_v53  ;;  %v576_v16 = vpop.f32.mrf.mxu2 }
 0x1cf   :  { %2758 = vmatpush.msrb.mxu0 %v4965_v55  ;;  %2874 = vmatpush.msrb.mxu2 %v2705_v5  ;;  %v577_v14 = vadd.f32 %v576_v16, %v536_v32 }
 0x1d0   :  { %2913 = vmatpush.msrb.mxu3 %v4967_v31  ;;  %2811 = vmatpush.msrb.mxu1 %v5008_v52 }
 0x1d1   :  { %2761 = vmatpush.msrb.mxu0 %v4980_v49  ;;  %2815 = vmatmul.f32.vlgmr.msrb.gmra.mxu1 %v2618_v6  ;;  %v678_v55 = vadd.f32 %v677_v26, %v577_v14  ;;  %v770_v31 = vpop.f32.mrf.mxu1 }
 0x1d2   :  { %2878 = vmatpush.msrb.mxu2 %v2711_v12  ;;  %2915 = vmatpush.msrb.mxu3 %v4982_v8 }
 0x1d3   :  { %2764 = vmatpush.msrb.mxu0 %v4993_v35  ;;  %2976 = vset.pattern.permute.xlu0 %v5487_v56 }
 0x1d4   :  { %2882 = vmatpush.msrb.mxu2 %v2717_v43  ;;  %2917 = vmatpush.msrb.mxu3 %v4995_v53  ;;  %v732_v53 = vadd.f32 %v731_v42, %v678_v55  ;;  %v876_v30 = vpop.f32.mrf.mxu3 }
 0x1d5   :  { %2961 = vmatmul.msk.f32.vlgmr.msrb.gmra.mxu2 %vm64_vm7, %v5373_v40  ;;  %2767 = vmatpush.msrb.mxu0 %v5006_v34  ;;  %v917_v35 = vpop.f32.mrf.mxu0 }
 0x1d6   :  { %2919 = vmatpush.msrb.mxu3 %v5008_v52  ;;  %v771_v23 = vadd.f32 %v770_v31, %v732_v53  ;;  %v839_v49 = vpop.f32.mrf.mxu2 }
 0x1d7   :  { %2962 = vmatmul.msk.f32.vlgmr.msrb.gmra.mxu3 %vm64_vm7, %v5373_v40  ;;  %2770 = vmatpush.msrb.mxu0 %v5021_v17 }
 0x1d8   :  { %v840_v8 = vadd.f32 %v839_v49, %v771_v23 }
 0x1d9   :  { %2773 = vmatpush.msrb.mxu0 %v5032_v41  ;;  %v1018_v52 = vpop.f32.mrf.mxu1 }
 0x1da   :  { %2776 = vmatmul.f32.vlgmr.msrb.gmra.mxu0 %v5049_v58  ;;  %v877_v4 = vadd.f32 %v876_v30, %v840_v8 }
 0x1dc   :  { %v918_v34 = vadd.f32 %v917_v35, %v877_v4  ;;  %v1111_v45 = vpop.f32.mrf.mxu3 }
 0x1dd   :  { %v1180_v17 = vpop.f32.mrf.mxu0 }
 0x1de   :  { %v1019_v47 = vadd.f32 %v1018_v52, %v918_v34  ;;  %v1072_v61 = vpop.f32.mrf.mxu2 }
 0x1e0   :  { %v1073_v40 = vadd.f32 %v1072_v61, %v1019_v47 }
 0x1e1   :  { %v1217_v41 = vpop.f32.mrf.mxu1 }
 0x1e2   :  { %v1112_v5 = vadd.f32 %v1111_v45, %v1073_v40 }
 0x1e4   :  { %v1181_v12 = vadd.f32 %v1180_v17, %v1112_v5  ;;  %v1359_v62 = vpop.f32.mrf.mxu3 }
 0x1e5   :  { %v1413_v39 = vpop.f32.mrf.mxu0 }
 0x1e6   :  { %v1218_v43 = vadd.f32 %v1217_v41, %v1181_v12  ;;  %v1258_v6 = vpop.f32.mrf.mxu2 }
 0x1e8   :  { %v1259_v58 = vadd.f32 %v1258_v6, %v1218_v43 }
 0x1e9   :  { %v1452_v50 = vpop.f32.mrf.mxu1 }
 0x1ea   :  { %v1360_v48 = vadd.f32 %v1359_v62, %v1259_v58 }
 0x1ec   :  { %v1414_v7 = vadd.f32 %v1413_v39, %v1360_v48  ;;  %v1558_v57 = vpop.f32.mrf.mxu3 }
 0x1ed   :  { %v1599_v1 = vpop.f32.mrf.mxu0 }
 0x1ee   :  { %v1453_v37 = vadd.f32 %v1452_v50, %v1414_v7  ;;  %v1521_v29 = vpop.f32.mrf.mxu2 }
 0x1f0   :  { %v1522_v18 = vadd.f32 %v1521_v29, %v1453_v37 }
 0x1f1   :  { %v1700_v33 = vpop.f32.mrf.mxu1 }
 0x1f2   :  { %v1559_v25 = vadd.f32 %v1558_v57, %v1522_v18 }
 0x1f4   :  { %v1600_v0 = vadd.f32 %v1599_v1, %v1559_v25  ;;  %v1793_v51 = vpop.f32.mrf.mxu3 }
 0x1f5   :  { %v1862_v3 = vpop.f32.mrf.mxu0 }
 0x1f6   :  { %v1701_v11 = vadd.f32 %v1700_v33, %v1600_v0  ;;  %v1754_v20 = vpop.f32.mrf.mxu2 }
 0x1f8   :  { %v1755_v36 = vadd.f32 %v1754_v20, %v1701_v11 }
 0x1f9   :  { %v1899_v27 = vpop.f32.mrf.mxu1 }
 0x1fa   :  { %v1794_v63 = vadd.f32 %v1793_v51, %v1755_v36 }
 0x1fc   :  { %v1863_v9 = vadd.f32 %v1862_v3, %v1794_v63  ;;  %v2041_v38 = vpop.f32.mrf.mxu3 }
 0x1fd   :  { %v2095_v60 = vpop.f32.mrf.mxu0 }
 0x1fe   :  { %v1900_v28 = vadd.f32 %v1899_v27, %v1863_v9  ;;  %v1940_v44 = vpop.f32.mrf.mxu2 }
 0x200   :  { %v1941_v59 = vadd.f32 %v1940_v44, %v1900_v28 }
 0x201   :  { %v2134_v15 = vpop.f32.mrf.mxu1 }
 0x202   :  { %v2042_v19 = vadd.f32 %v2041_v38, %v1941_v59 }
 0x204   :  { %v2096_v10 = vadd.f32 %v2095_v60, %v2042_v19  ;;  %v2240_v21 = vpop.f32.mrf.mxu3 }
 0x206   :  { %v2135_v54 = vadd.f32 %v2134_v15, %v2096_v10  ;;  %v2203_v2 = vpop.f32.mrf.mxu2 }
 0x208   :  { %v2204_v46 = vadd.f32 %v2203_v2, %v2135_v54 }
 0x20a   :  { %v2241_v13 = vadd.f32 %v2240_v21, %v2204_v46 }
 0x214   :  { %v2281_v24 = vpop.f32.mrf.mxu0 }
 0x215   :  { %v2282_v22 = vadd.f32 %v2281_v24, %v2241_v13 }
 0x218   :  { %v2382_v32 = vpop.f32.mrf.mxu1  ;;  %v2436_v56 = vpop.f32.mrf.mxu2 }
 0x219   :  { %v2383_v16 = vadd.f32 %v2382_v32, %v2282_v22 }
 0x21b   :  { %v2437_v14 = vadd.f32 %v2436_v56, %v2383_v16  ;;  %v2475_v26 = vpop.f32.mrf.mxu3 }
 0x21d   :  { %v2476_v55 = vadd.f32 %v2475_v26, %v2437_v14 }
 0x22c   :  { %v2581_v31 = vpop.f32.mrf.mxu1 }
 0x237   :  { %v2544_v42 = vpop.f32.mrf.mxu0 }
 0x238   :  { %v2545_v53 = vadd.f32 %v2544_v42, %v2476_v55  ;;  %v2723_v30 = vpop.f32.mrf.mxu3 }
 0x23a   :  { %v2582_v23 = vadd.f32 %v2581_v31, %v2545_v53 }
 0x23b   :  { %v2622_v49 = vpop.f32.mrf.mxu2 }
 0x23c   :  { %v2623_v8 = vadd.f32 %v2622_v49, %v2582_v23 }
 0x23e   :  { %v2724_v35 = vadd.f32 %v2723_v30, %v2623_v8 }
 0x24e   :  { %v2816_v52 = vpop.f32.mrf.mxu1 }
 0x257   :  { %v2777_v4 = vpop.f32.mrf.mxu0 }
 0x258   :  { %v2778_v34 = vadd.f32 %v2777_v4, %v2724_v35  ;;  %v2885_v61 = vpop.f32.mrf.mxu2 }
 0x25a   :  { %v2817_v47 = vadd.f32 %v2816_v52, %v2778_v34  ;;  %v2922_v45 = vpop.f32.mrf.mxu3 }
 0x25c   :  { %v2886_v40 = vadd.f32 %v2885_v61, %v2817_v47 }
 0x25e   :  { %v2923_v17 = vadd.f32 %v2922_v45, %v2886_v40 }
 0x260   :  { %2925 = vst [vmem:[%s5200_s3] sm:$0xff] %v2923_v17 }
 0x261   :  { %2930 = vsyncpa [#allocation3], 1 }

</bundles_post_ra>
